<compile_context>
chip_gen: v7x
topology: tpu7x:2x2x1
jax: 0.10.0
libtpu: 0.0.40
codegen_flags: <defaults>
</compile_context>

<pallas_src>
import jax
import jax.numpy as jnp
from jax.experimental import pallas as pl
from jax.experimental.pallas import tpu as pltpu


def _round_up(x, m):
    return (x + m - 1) // m * m


def _cdiv(a, b):
    return -(-a // b)


# ---------------------------------------------------------------------------
# Shared post-gather compute: GMF + MLP + ReLU + FC + per-row sums of squares.
# Writes a single (4, TB) lane-dense block: row 0 = scores, rows 1-3 = partial
# sums of squares for pe / qe / re (sqrt + sum happen in the wrapper).
# ---------------------------------------------------------------------------
def _ncf_core(pe, qe, re, wp, wq, wr, b, fc, out_ref):
    # GMF branch: elementwise triple product (VPU).
    gmf = pe * qe * re                                                   # [TB, D]

    # MLP branch: cat([pe,qe,re]) @ W.T + b as three [TB,D]x[D,D] MXU matmuls
    # against pre-split/pre-transposed weight blocks (no in-kernel concat).
    mlp = (jnp.dot(pe, wp, preferred_element_type=jnp.float32)
           + jnp.dot(qe, wq, preferred_element_type=jnp.float32)
           + jnp.dot(re, wr, preferred_element_type=jnp.float32)
           + b)                                                          # [TB, D]

    h = jnp.maximum(gmf + mlp, 0.0)                                      # [TB, D]

    # Final FC (Linear(D,1,bias=False)) as VPU multiply + lane reduce instead of a
    # degenerate N=1 MXU matvec.
    score = jnp.sum(h * fc, axis=-1)                                     # [TB]
    pss = jnp.sum(pe * pe, axis=-1)                                      # [TB]
    qss = jnp.sum(qe * qe, axis=-1)                                      # [TB]
    rss = jnp.sum(re * re, axis=-1)                                      # [TB]

    out_ref[...] = jnp.concatenate(
        [score[None, :], pss[None, :], qss[None, :], rss[None, :]], axis=0
    ).astype(out_ref.dtype)                                              # [4, TB]


def _onehot_gather(idx_ref, tab_ref):
    """Exact in-VMEM embedding gather via one-hot MXU matmul.

    idx_ref: (TB, 1) int32 block; tab_ref: (Np, D) resident table (rows >= N are
    zero padding, never selected by valid indices).
    """
    idx = idx_ref[...]                                       # [TB, 1] int32
    tab = tab_ref[...].astype(jnp.float32)                   # [Np, D]
    n = tab_ref.shape[0]
    iota = jax.lax.broadcasted_iota(jnp.int32, (1, n), 1)    # [1, Np]
    onehot = (idx == iota).astype(jnp.float32)               # [TB, Np]
    return jnp.dot(onehot, tab, preferred_element_type=jnp.float32)  # [TB, D]


# ---------------------------------------------------------------------------
# Kernel 1: fused-gather path (tables resident in VMEM, indices streamed).
# ---------------------------------------------------------------------------
def _ncf_fused_kernel(pi_ref, qi_ref, ri_ref, pt_ref, qt_ref, rt_ref,
                      wp_ref, wq_ref, wr_ref, b_ref, fc_ref, out_ref):
    pe = _onehot_gather(pi_ref, pt_ref)                      # [TB, D] f32
    qe = _onehot_gather(qi_ref, qt_ref)
    re = _onehot_gather(ri_ref, rt_ref)
    _ncf_core(pe, qe, re,
              wp_ref[...].astype(jnp.float32),
              wq_ref[...].astype(jnp.float32),
              wr_ref[...].astype(jnp.float32),
              b_ref[...].astype(jnp.float32),
              fc_ref[...].astype(jnp.float32),
              out_ref)


# ---------------------------------------------------------------------------
# Kernel 2: fallback streaming path (XLA-gathered embeddings streamed in).
# ---------------------------------------------------------------------------
def _ncf_stream_kernel(pe_ref, qe_ref, re_ref, wp_ref, wq_ref, wr_ref,
                       b_ref, fc_ref, out_ref):
    _ncf_core(pe_ref[...].astype(jnp.float32),
              qe_ref[...].astype(jnp.float32),
              re_ref[...].astype(jnp.float32),
              wp_ref[...].astype(jnp.float32),
              wq_ref[...].astype(jnp.float32),
              wr_ref[...].astype(jnp.float32),
              b_ref[...].astype(jnp.float32),
              fc_ref[...].astype(jnp.float32),
              out_ref)


def ncf_triple_forward(ps, qs, rs, p_table, q_table, r_table,
                       w_weight, w_bias, fc_weight, reg,
                       *, force_xla_gather=False):
    """NCF_Triple.forward: returns (inferences [B, 1], regs scalar)."""
    # TODO(synk): constrain(...) treated as identity (undefined in the source).
    B = int(ps.shape[0])
    D = int(p_table.shape[1])

    # --- batch tile sizing -------------------------------------------------
    # Large tiles (cap 4096 rows, multiple of 128) keep the kernel near the HBM
    # roofline; double-buffered inputs stay well under the 16/32 MiB scoped VMEM
    # defaults.  If the batch spans more than one minimal tile, force >= 2 tiles
    # so the "parallel" grid axis can shard across both v7x TensorCores.
    TB_CAP = 4096
    TB = min(TB_CAP, _round_up(max(B, 1), 128))
    if B > 128:
        TB = min(TB, _round_up(_cdiv(B, 2), 128))
    num_tiles = _cdiv(B, TB)
    B_pad = num_tiles * TB
    pad = B_pad - B

    # Split Linear(3D, D) weight into three [D, D] right-multiply blocks (resident).
    wpT = w_weight[:, :D].T.astype(jnp.float32)
    wqT = w_weight[:, D:2 * D].T.astype(jnp.float32)
    wrT = w_weight[:, 2 * D:].T.astype(jnp.float32)
    bias = w_bias.reshape(1, D).astype(jnp.float32)
    fcw = fc_weight.reshape(1, D).astype(jnp.float32)

    out_shape = jax.ShapeDtypeStruct((4, B_pad), jnp.float32)
    out_spec = pl.BlockSpec((4, TB), lambda i: (0, i))
    cparams = pltpu.CompilerParams(dimension_semantics=("parallel",))

    # Fused in-kernel gather only while the one-hot stays cheap / tables stay tiny
    # in VMEM.  Larger tables fall back to the XLA gather below.
    MAX_ONEHOT_ROWS = 128
    pad_rows = lambda t: max(8, _round_up(int(t.shape[0]), 8))
    use_fused = (not force_xla_gather) and all(
        pad_rows(t) <= MAX_ONEHOT_ROWS for t in (p_table, q_table, r_table))

    if use_fused:
        def prep_table(t):
            n = int(t.shape[0])
            return jnp.pad(t.astype(jnp.float32), ((0, pad_rows(t) - n), (0, 0)))

        pt = prep_table(p_table)
        qt = prep_table(q_table)
        rt = prep_table(r_table)

        def prep_idx(ix):
            return jnp.pad(ix.astype(jnp.int32), (0, pad)).reshape(B_pad, 1)

        psi, qsi, rsi = prep_idx(ps), prep_idx(qs), prep_idx(rs)

        out = pl.pallas_call(
            _ncf_fused_kernel,
            out_shape=out_shape,
            grid_spec=pltpu.PrefetchScalarGridSpec(
                num_scalar_prefetch=0,
                grid=(num_tiles,),
                in_specs=[
                    pl.BlockSpec((TB, 1), lambda i: (i, 0)),           # ps idx tile
                    pl.BlockSpec((TB, 1), lambda i: (i, 0)),           # qs idx tile
                    pl.BlockSpec((TB, 1), lambda i: (i, 0)),           # rs idx tile
                    pl.BlockSpec(pt.shape, lambda i: (0, 0)),          # P table (resident)
                    pl.BlockSpec(qt.shape, lambda i: (0, 0)),          # Q table (resident)
                    pl.BlockSpec(rt.shape, lambda i: (0, 0)),          # R table (resident)
                    pl.BlockSpec((D, D), lambda i: (0, 0)),            # W_p^T (resident)
                    pl.BlockSpec((D, D), lambda i: (0, 0)),            # W_q^T (resident)
                    pl.BlockSpec((D, D), lambda i: (0, 0)),            # W_r^T (resident)
                    pl.BlockSpec((1, D), lambda i: (0, 0)),            # bias  (resident)
                    pl.BlockSpec((1, D), lambda i: (0, 0)),            # fc    (resident)
                ],
                out_specs=out_spec,
            ),
            compiler_params=cparams,
        )(psi, qsi, rsi, pt, qt, rt, wpT, wqT, wrT, bias, fcw)
    else:
        # Pad *index* arrays (valid row 0) so gathers produce (B_pad, D) directly;
        # padded rows are sliced off after the kernel.
        ps_p = jnp.pad(ps, (0, pad))
        qs_p = jnp.pad(qs, (0, pad))
        rs_p = jnp.pad(rs, (0, pad))

        # Keep the table dtype (no wrapper upcast) — the kernel upcasts to f32,
        # halving input HBM traffic when tables are bf16.
        pe = jnp.take(p_table, ps_p, axis=0)
        qe = jnp.take(q_table, qs_p, axis=0)
        re = jnp.take(r_table, rs_p, axis=0)

        out = pl.pallas_call(
            _ncf_stream_kernel,
            out_shape=out_shape,
            grid_spec=pltpu.PrefetchScalarGridSpec(
                num_scalar_prefetch=0,
                grid=(num_tiles,),
                in_specs=[
                    pl.BlockSpec((TB, D), lambda i: (i, 0)),           # pe tile
                    pl.BlockSpec((TB, D), lambda i: (i, 0)),           # qe tile
                    pl.BlockSpec((TB, D), lambda i: (i, 0)),           # re tile
                    pl.BlockSpec((D, D), lambda i: (0, 0)),            # W_p^T (resident)
                    pl.BlockSpec((D, D), lambda i: (0, 0)),            # W_q^T (resident)
                    pl.BlockSpec((D, D), lambda i: (0, 0)),            # W_r^T (resident)
                    pl.BlockSpec((1, D), lambda i: (0, 0)),            # bias  (resident)
                    pl.BlockSpec((1, D), lambda i: (0, 0)),            # fc    (resident)
                ],
                out_specs=out_spec,
            ),
            compiler_params=cparams,
        )(pe, qe, re, wpT, wqT, wrT, bias, fcw)

    # Drop padded rows, restore torch layout / reduce regularizer partials.
    inferences = out[0, :B].reshape(B, 1)
    regs = reg * (jnp.sqrt(jnp.sum(out[1, :B]))
                  + jnp.sqrt(jnp.sum(out[2, :B]))
                  + jnp.sqrt(jnp.sum(out[3, :B])))
    return inferences, regs


if __name__ == "__main__":
    # Small deterministic setup consistent with the module's __init__.
    num_ps, num_qs, num_rs = 10, 12, 14
    embedding_dim = 32
    reg = 0.01
    batch = 8

    key = jax.random.PRNGKey(0)
    keys = jax.random.split(key, 9)

    p_table = jax.random.normal(keys[0], (num_ps, embedding_dim), dtype=jnp.float32)
    q_table = jax.random.normal(keys[1], (num_qs, embedding_dim), dtype=jnp.float32)
    r_table = jax.random.normal(keys[2], (num_rs, embedding_dim), dtype=jnp.float32)
    # nn.Linear(3D, D): weight [D, 3D], bias [D]; nn.Linear(D, 1, bias=False): weight [1, D].
    w_weight = jax.random.normal(keys[3], (embedding_dim, 3 * embedding_dim),
                                 dtype=jnp.float32) * 0.1
    w_bias = jax.random.normal(keys[4], (embedding_dim,), dtype=jnp.float32) * 0.1
    fc_weight = jax.random.normal(keys[5], (1, embedding_dim), dtype=jnp.float32) * 0.1

    ps = jax.random.randint(keys[6], (batch,), 0, num_ps, dtype=jnp.int32)
    qs = jax.random.randint(keys[7], (batch,), 0, num_qs, dtype=jnp.int32)
    rs = jax.random.randint(keys[8], (batch,), 0, num_rs, dtype=jnp.int32)

    # Pure-JAX reference.
    pe = jnp.take(p_table, ps, axis=0)
    qe = jnp.take(q_table, qs, axis=0)
    re = jnp.take(r_table, rs, axis=0)
    gmf = pe * qe * re
    mlp = jnp.concatenate([pe, qe, re], axis=-1) @ w_weight.T + w_bias
    ref_inf = jnp.maximum(gmf + mlp, 0.0) @ fc_weight.T
    ref_reg = reg * (jnp.linalg.norm(pe) + jnp.linalg.norm(qe) + jnp.linalg.norm(re))

    # Path 1: fused in-kernel gather (tables resident in VMEM).
    inf_fused, reg_fused = ncf_triple_forward(
        ps, qs, rs, p_table, q_table, r_table, w_weight, w_bias, fc_weight, reg)
    jax.block_until_ready((inf_fused, reg_fused))
    assert jnp.allclose(inf_fused, ref_inf, atol=1e-3, rtol=1e-3), (inf_fused, ref_inf)
    assert jnp.allclose(reg_fused, ref_reg, atol=1e-3, rtol=1e-3), (reg_fused, ref_reg)

    # Path 2: fallback streaming kernel (XLA gather), also exercised for coverage.
    inf_stream, reg_stream = ncf_triple_forward(
        ps, qs, rs, p_table, q_table, r_table, w_weight, w_bias, fc_weight, reg,
        force_xla_gather=True)
    jax.block_until_ready((inf_stream, reg_stream))
    assert jnp.allclose(inf_stream, ref_inf, atol=1e-3, rtol=1e-3), (inf_stream, ref_inf)
    assert jnp.allclose(reg_stream, ref_reg, atol=1e-3, rtol=1e-3), (reg_stream, ref_reg)

    print("KERNEL_OK")
</pallas_src>

<mosaic_0001>
module attributes {stable_mosaic.version = 11 : i64} {
  func.func @_ncf_fused_kernel(%arg0: i32, %arg1: memref<128x1xi32, #tpu.memory_space<vmem>>, %arg2: memref<128x1xi32, #tpu.memory_space<vmem>>, %arg3: memref<128x1xi32, #tpu.memory_space<vmem>>, %arg4: memref<16x32xf32, #tpu.memory_space<vmem>>, %arg5: memref<16x32xf32, #tpu.memory_space<vmem>>, %arg6: memref<16x32xf32, #tpu.memory_space<vmem>>, %arg7: memref<32x32xf32, #tpu.memory_space<vmem>>, %arg8: memref<32x32xf32, #tpu.memory_space<vmem>>, %arg9: memref<32x32xf32, #tpu.memory_space<vmem>>, %arg10: memref<1x32xf32, #tpu.memory_space<vmem>>, %arg11: memref<1x32xf32, #tpu.memory_space<vmem>>, %arg12: memref<4x128xf32, #tpu.memory_space<vmem>>) attributes {dimension_semantics = [#tpu.dimension_semantics<parallel>], iteration_bounds = array<i64: 1>, scalar_prefetch = 0 : i64, scratch_operands = 0 : i64, tpu.core_type = #tpu.core_type<tc>, window_params = [{transform_indices = @transform_0, window_bounds = array<i64: 128, 1>}, {transform_indices = @transform_1, window_bounds = array<i64: 128, 1>}, {transform_indices = @transform_2, window_bounds = array<i64: 128, 1>}, {pipeline_mode = #tpu.pipeline_mode<synchronous>, transform_indices = @transform_3, window_bounds = array<i64: 16, 32>}, {pipeline_mode = #tpu.pipeline_mode<synchronous>, transform_indices = @transform_4, window_bounds = array<i64: 16, 32>}, {pipeline_mode = #tpu.pipeline_mode<synchronous>, transform_indices = @transform_5, window_bounds = array<i64: 16, 32>}, {pipeline_mode = #tpu.pipeline_mode<synchronous>, transform_indices = @transform_6, window_bounds = array<i64: 32, 32>}, {pipeline_mode = #tpu.pipeline_mode<synchronous>, transform_indices = @transform_7, window_bounds = array<i64: 32, 32>}, {pipeline_mode = #tpu.pipeline_mode<synchronous>, transform_indices = @transform_8, window_bounds = array<i64: 32, 32>}, {pipeline_mode = #tpu.pipeline_mode<synchronous>, transform_indices = @transform_9, window_bounds = array<i64: 1, 32>}, {pipeline_mode = #tpu.pipeline_mode<synchronous>, transform_indices = @transform_10, window_bounds = array<i64: 1, 32>}, {transform_indices = @transform_11, window_bounds = array<i64: 4, 128>}]} {
    %c0 = arith.constant 0 : index
    %c0_0 = arith.constant 0 : index
    %0 = vector.load %arg1[%c0, %c0_0] : memref<128x1xi32, #tpu.memory_space<vmem>>, vector<128x1xi32>
    %c0_1 = arith.constant 0 : index
    %c0_2 = arith.constant 0 : index
    %1 = vector.load %arg4[%c0_1, %c0_2] : memref<16x32xf32, #tpu.memory_space<vmem>>, vector<16x32xf32>
    %2 = tpu.iota {dimensions = array<i32: 1>} : vector<1x16xi32>
    %3 = vector.broadcast %0 : vector<128x1xi32> to vector<128x16xi32>
    %4 = vector.broadcast %2 : vector<1x16xi32> to vector<128x16xi32>
    %5 = arith.cmpi eq, %3, %4 : vector<128x16xi32>
    %6 = arith.extui %5 : vector<128x16xi1> to vector<128x16xi32>
    %7 = arith.sitofp %6 : vector<128x16xi32> to vector<128x16xf32>
    %cst = arith.constant dense<0.000000e+00> : vector<128x32xf32>
    %8 = tpu.matmul %7, %1, %cst {dimension_numbers = #tpu.dot_dimension_numbers<[1], [0], [0], [1], [0, 0, 1, 1], [], []>} : vector<128x16xf32>, vector<16x32xf32>, vector<128x32xf32> -> vector<128x32xf32>
    %c0_3 = arith.constant 0 : index
    %c0_4 = arith.constant 0 : index
    %9 = vector.load %arg2[%c0_3, %c0_4] : memref<128x1xi32, #tpu.memory_space<vmem>>, vector<128x1xi32>
    %c0_5 = arith.constant 0 : index
    %c0_6 = arith.constant 0 : index
    %10 = vector.load %arg5[%c0_5, %c0_6] : memref<16x32xf32, #tpu.memory_space<vmem>>, vector<16x32xf32>
    %11 = tpu.iota {dimensions = array<i32: 1>} : vector<1x16xi32>
    %12 = vector.broadcast %9 : vector<128x1xi32> to vector<128x16xi32>
    %13 = vector.broadcast %11 : vector<1x16xi32> to vector<128x16xi32>
    %14 = arith.cmpi eq, %12, %13 : vector<128x16xi32>
    %15 = arith.extui %14 : vector<128x16xi1> to vector<128x16xi32>
    %16 = arith.sitofp %15 : vector<128x16xi32> to vector<128x16xf32>
    %cst_7 = arith.constant dense<0.000000e+00> : vector<128x32xf32>
    %17 = tpu.matmul %16, %10, %cst_7 {dimension_numbers = #tpu.dot_dimension_numbers<[1], [0], [0], [1], [0, 0, 1, 1], [], []>} : vector<128x16xf32>, vector<16x32xf32>, vector<128x32xf32> -> vector<128x32xf32>
    %c0_8 = arith.constant 0 : index
    %c0_9 = arith.constant 0 : index
    %18 = vector.load %arg3[%c0_8, %c0_9] : memref<128x1xi32, #tpu.memory_space<vmem>>, vector<128x1xi32>
    %c0_10 = arith.constant 0 : index
    %c0_11 = arith.constant 0 : index
    %19 = vector.load %arg6[%c0_10, %c0_11] : memref<16x32xf32, #tpu.memory_space<vmem>>, vector<16x32xf32>
    %20 = tpu.iota {dimensions = array<i32: 1>} : vector<1x16xi32>
    %21 = vector.broadcast %18 : vector<128x1xi32> to vector<128x16xi32>
    %22 = vector.broadcast %20 : vector<1x16xi32> to vector<128x16xi32>
    %23 = arith.cmpi eq, %21, %22 : vector<128x16xi32>
    %24 = arith.extui %23 : vector<128x16xi1> to vector<128x16xi32>
    %25 = arith.sitofp %24 : vector<128x16xi32> to vector<128x16xf32>
    %cst_12 = arith.constant dense<0.000000e+00> : vector<128x32xf32>
    %26 = tpu.matmul %25, %19, %cst_12 {dimension_numbers = #tpu.dot_dimension_numbers<[1], [0], [0], [1], [0, 0, 1, 1], [], []>} : vector<128x16xf32>, vector<16x32xf32>, vector<128x32xf32> -> vector<128x32xf32>
    %c0_13 = arith.constant 0 : index
    %c0_14 = arith.constant 0 : index
    %27 = vector.load %arg7[%c0_13, %c0_14] : memref<32x32xf32, #tpu.memory_space<vmem>>, vector<32x32xf32>
    %c0_15 = arith.constant 0 : index
    %c0_16 = arith.constant 0 : index
    %28 = vector.load %arg8[%c0_15, %c0_16] : memref<32x32xf32, #tpu.memory_space<vmem>>, vector<32x32xf32>
    %c0_17 = arith.constant 0 : index
    %c0_18 = arith.constant 0 : index
    %29 = vector.load %arg9[%c0_17, %c0_18] : memref<32x32xf32, #tpu.memory_space<vmem>>, vector<32x32xf32>
    %c0_19 = arith.constant 0 : index
    %c0_20 = arith.constant 0 : index
    %30 = vector.load %arg10[%c0_19, %c0_20] : memref<1x32xf32, #tpu.memory_space<vmem>>, vector<1x32xf32>
    %c0_21 = arith.constant 0 : index
    %c0_22 = arith.constant 0 : index
    %31 = vector.load %arg11[%c0_21, %c0_22] : memref<1x32xf32, #tpu.memory_space<vmem>>, vector<1x32xf32>
    %32 = arith.mulf %8, %17 : vector<128x32xf32>
    %33 = arith.mulf %32, %26 : vector<128x32xf32>
    %cst_23 = arith.constant dense<0.000000e+00> : vector<128x32xf32>
    %34 = tpu.matmul %8, %27, %cst_23 {dimension_numbers = #tpu.dot_dimension_numbers<[1], [0], [0], [1], [0, 0, 1, 1], [], []>} : vector<128x32xf32>, vector<32x32xf32>, vector<128x32xf32> -> vector<128x32xf32>
    %cst_24 = arith.constant dense<0.000000e+00> : vector<128x32xf32>
    %35 = tpu.matmul %17, %28, %cst_24 {dimension_numbers = #tpu.dot_dimension_numbers<[1], [0], [0], [1], [0, 0, 1, 1], [], []>} : vector<128x32xf32>, vector<32x32xf32>, vector<128x32xf32> -> vector<128x32xf32>
    %36 = arith.addf %34, %35 : vector<128x32xf32>
    %cst_25 = arith.constant dense<0.000000e+00> : vector<128x32xf32>
    %37 = tpu.matmul %26, %29, %cst_25 {dimension_numbers = #tpu.dot_dimension_numbers<[1], [0], [0], [1], [0, 0, 1, 1], [], []>} : vector<128x32xf32>, vector<32x32xf32>, vector<128x32xf32> -> vector<128x32xf32>
    %38 = arith.addf %36, %37 : vector<128x32xf32>
    %39 = vector.broadcast %30 : vector<1x32xf32> to vector<128x32xf32>
    %40 = arith.addf %38, %39 : vector<128x32xf32>
    %41 = arith.addf %33, %40 : vector<128x32xf32>
    %cst_26 = arith.constant 0.000000e+00 : f32
    %42 = vector.broadcast %cst_26 : f32 to vector<128x32xf32>
    %43 = arith.maximumf %41, %42 : vector<128x32xf32>
    %44 = vector.broadcast %31 : vector<1x32xf32> to vector<128x32xf32>
    %45 = arith.mulf %43, %44 : vector<128x32xf32>
    %cst_27 = arith.constant dense<0.000000e+00> : vector<128xf32>
    %46 = vector.multi_reduction <add>, %45, %cst_27 [1] : vector<128x32xf32> to vector<128xf32>
    %47 = arith.mulf %8, %8 : vector<128x32xf32>
    %cst_28 = arith.constant dense<0.000000e+00> : vector<128xf32>
    %48 = vector.multi_reduction <add>, %47, %cst_28 [1] : vector<128x32xf32> to vector<128xf32>
    %49 = arith.mulf %17, %17 : vector<128x32xf32>
    %cst_29 = arith.constant dense<0.000000e+00> : vector<128xf32>
    %50 = vector.multi_reduction <add>, %49, %cst_29 [1] : vector<128x32xf32> to vector<128xf32>
    %51 = arith.mulf %26, %26 : vector<128x32xf32>
    %cst_30 = arith.constant dense<0.000000e+00> : vector<128xf32>
    %52 = vector.multi_reduction <add>, %51, %cst_30 [1] : vector<128x32xf32> to vector<128xf32>
    %53 = vector.shape_cast %46 : vector<128xf32> to vector<1x128xf32>
    %54 = vector.shape_cast %48 : vector<128xf32> to vector<1x128xf32>
    %55 = vector.shape_cast %50 : vector<128xf32> to vector<1x128xf32>
    %56 = vector.shape_cast %52 : vector<128xf32> to vector<1x128xf32>
    %57 = tpu.concatenate %53, %54, %55, %56 in 0 : vector<1x128xf32>, vector<1x128xf32>, vector<1x128xf32>, vector<1x128xf32> -> vector<4x128xf32>
    %c0_31 = arith.constant 0 : index
    %c0_32 = arith.constant 0 : index
    %58 = vector.load %arg12[%c0_31, %c0_32] : memref<4x128xf32, #tpu.memory_space<vmem>>, vector<4x128xf32>
    tpu.vector_store %arg12[%c0_31, %c0_32], %57 {strides = array<i32>} : memref<4x128xf32, #tpu.memory_space<vmem>>, vector<4x128xf32>,
    return
  }
  func.func @transform_0(%arg0: i32) -> (i32, i32) {
    %c0_i32 = arith.constant 0 : i32
    %c0_i32_0 = arith.constant 0 : i32
    return %arg0, %c0_i32 : i32, i32
  }
  func.func @transform_1(%arg0: i32) -> (i32, i32) {
    %c0_i32 = arith.constant 0 : i32
    %c0_i32_0 = arith.constant 0 : i32
    return %arg0, %c0_i32 : i32, i32
  }
  func.func @transform_2(%arg0: i32) -> (i32, i32) {
    %c0_i32 = arith.constant 0 : i32
    %c0_i32_0 = arith.constant 0 : i32
    return %arg0, %c0_i32 : i32, i32
  }
  func.func @transform_3(%arg0: i32) -> (i32, i32) {
    %c0_i32 = arith.constant 0 : i32
    %c0_i32_0 = arith.constant 0 : i32
    %c0_i32_1 = arith.constant 0 : i32
    return %c0_i32, %c0_i32_0 : i32, i32
  }
  func.func @transform_4(%arg0: i32) -> (i32, i32) {
    %c0_i32 = arith.constant 0 : i32
    %c0_i32_0 = arith.constant 0 : i32
    %c0_i32_1 = arith.constant 0 : i32
    return %c0_i32, %c0_i32_0 : i32, i32
  }
  func.func @transform_5(%arg0: i32) -> (i32, i32) {
    %c0_i32 = arith.constant 0 : i32
    %c0_i32_0 = arith.constant 0 : i32
    %c0_i32_1 = arith.constant 0 : i32
    return %c0_i32, %c0_i32_0 : i32, i32
  }
  func.func @transform_6(%arg0: i32) -> (i32, i32) {
    %c0_i32 = arith.constant 0 : i32
    %c0_i32_0 = arith.constant 0 : i32
    %c0_i32_1 = arith.constant 0 : i32
    return %c0_i32, %c0_i32_0 : i32, i32
  }
  func.func @transform_7(%arg0: i32) -> (i32, i32) {
    %c0_i32 = arith.constant 0 : i32
    %c0_i32_0 = arith.constant 0 : i32
    %c0_i32_1 = arith.constant 0 : i32
    return %c0_i32, %c0_i32_0 : i32, i32
  }
  func.func @transform_8(%arg0: i32) -> (i32, i32) {
    %c0_i32 = arith.constant 0 : i32
    %c0_i32_0 = arith.constant 0 : i32
    %c0_i32_1 = arith.constant 0 : i32
    return %c0_i32, %c0_i32_0 : i32, i32
  }
  func.func @transform_9(%arg0: i32) -> (i32, i32) {
    %c0_i32 = arith.constant 0 : i32
    %c0_i32_0 = arith.constant 0 : i32
    %c0_i32_1 = arith.constant 0 : i32
    return %c0_i32, %c0_i32_0 : i32, i32
  }
  func.func @transform_10(%arg0: i32) -> (i32, i32) {
    %c0_i32 = arith.constant 0 : i32
    %c0_i32_0 = arith.constant 0 : i32
    %c0_i32_1 = arith.constant 0 : i32
    return %c0_i32, %c0_i32_0 : i32, i32
  }
  func.func @transform_11(%arg0: i32) -> (i32, i32) {
    %c0_i32 = arith.constant 0 : i32
    %c0_i32_0 = arith.constant 0 : i32
    return %c0_i32, %arg0 : i32, i32
  }
}

</mosaic_0001>

<bundles_post_ra>
// kernel: tpu_custom_call.1
= control target key start
LH: loop header
LB: loop body
LE: loop exit
PB: predicated region body
PF: predicated region fallthrough
CT: control target
= control target key end

     0   :  { %v2893_v2 = vmov 0   ;;  %s3909_s0 = inlined_call_operand.vmem [shape: s32[128,1], index: 0, kind: input, shape index: {}]   ;;  %s3910_s1 = inlined_call_operand.vmem [shape: s32[128,1], index: 1, kind: input, shape index: {}]   ;;  %s3911_s2 = inlined_call_operand.vmem [shape: s32[128,1], index: 2, kind: input, shape index: {}]   ;;  %s3912_s3 = inlined_call_operand.vmem [shape: f32[16,32], index: 3, kind: input, shape index: {}]   ;;  %s3913_s4 = inlined_call_operand.vmem [shape: f32[16,32], index: 4, kind: input, shape index: {}]   ;;  %s3914_s5 = inlined_call_operand.vmem [shape: f32[16,32], index: 5, kind: input, shape index: {}]   ;;  %s3915_s6 = inlined_call_operand.vmem [shape: f32[32,32], index: 6, kind: input, shape index: {}]   ;;  %s3916_s7 = inlined_call_operand.vmem [shape: f32[32,32], index: 7, kind: input, shape index: {}]   ;;  %s3917_s8 = inlined_call_operand.vmem [shape: f32[32,32], index: 8, kind: input, shape index: {}]   ;;  %s3918_s9 = inlined_call_operand.vmem [shape: f32[1,32], index: 9, kind: input, shape index: {}]   ;;  %s3919_s10 = inlined_call_operand.vmem [shape: f32[1,32], index: 10, kind: input, shape index: {}]   ;;  %s3920_s11 = inlined_call_operand.hbm [shape: f32[4,128], index: 11, kind: output, shape index: {}]  }
   0x1   :  { %v41_v0 = vld [vmem:[%s3909_s0 + $0x10] sm:$0xff]  ;;  %v39_v1 = vld [vmem:[%s3909_s0] sm:$0xff]  ;;  %2868 = vset.pattern.permute.xlu1 %v2893_v2  ;;  %2867 = vset.pattern.permute.xlu0 %v2893_v2  ;;  %v42_v3 = vld [vmem:[%s3909_s0 + $0x18] sm:$0xff] }
   0x2   :  { %66 = vperm.xlu1 %2868, %v41_v0   ;;  %60 = vperm.xlu0 %2867, %v39_v1   ;;  %v40_v4 = vld [vmem:[%s3909_s0 + $0x8] sm:$0xff]  ;;  %v43_v6 = vld [vmem:[%s3909_s0 + $0x20] sm:$0xff]  ;;  %v46_v7 = vld [vmem:[%s3909_s0 + $0x38] sm:$0xff] }
   0x3   :  { %v44_v5 = vld [vmem:[%s3909_s0 + $0x28] sm:$0xff]  ;;  %v45_v8 = vld [vmem:[%s3909_s0 + $0x30] sm:$0xff]  ;;  %v47_v10 = vld [vmem:[%s3909_s0 + $0x40] sm:$0xff] }
   0x4   :  { %v48_v9 = vld [vmem:[%s3909_s0 + $0x48] sm:$0xff]  ;;  %v55_v11 = vld [vmem:[%s3912_s3] sm:$0xff] }
   0x5   :  { %v56_v12 = vld [vmem:[%s3912_s3 + $0x8] sm:$0xff] }
   0x6   :  { %69 = vperm.xlu1 %2868, %v42_v3   ;;  %63 = vperm.xlu0 %2867, %v40_v4  }
   0xa   :  { %75 = vperm.xlu1 %2868, %v44_v5   ;;  %72 = vperm.xlu0 %2867, %v43_v6  }
   0xe   :  { %81 = vperm.xlu1 %2868, %v46_v7   ;;  %78 = vperm.xlu0 %2867, %v45_v8  }
   0xf   :  { %16 = vsyncpa [#allocation3], 0  ;;  %v2796_v13 = vpack.c.bf16 %v56_v12, %v55_v11  ;;  %v50_v14 = vld [vmem:[%s3909_s0 + $0x58] sm:$0xff]  ;;  %v49_v15 = vld [vmem:[%s3909_s0 + $0x50] sm:$0xff]  ;;  %v57_v61 = vlaneseq  ;;  %vm155_vm0 = vcmask 130048   ;;  %v2894_v1 = vmov 0.0  }
  0x10   :  { %v52_v16 = vld [vmem:[%s3909_s0 + $0x68] sm:$0xff]  ;;  %v51_v17 = vld [vmem:[%s3909_s0 + $0x60] sm:$0xff]  ;;  %v54_v18 = vld [vmem:[%s3909_s0 + $0x78] sm:$0xff] }
  0x11   :  { %2797 = vmatprep.subr.bf16.mxu0 %v2796_v13  ;;  %v53_v19 = vld [vmem:[%s3909_s0 + $0x70] sm:$0xff]  ;;  %v656_v20 = vld [vmem:[%s3911_s2] sm:$0xff]  ;;  %v673_v23 = vld [vmem:[%s3914_s5 + $0x8] sm:$0xff]  ;;  %v3131_v62 = vand.u32 127, %v57_v61 }
  0x12   :  { %87 = vperm.xlu1 %2868, %v48_v9   ;;  %84 = vperm.xlu0 %2867, %v47_v10   ;;  %v349_v21 = vld [vmem:[%s3910_s1] sm:$0xff]  ;;  %v366_v26 = vld [vmem:[%s3913_s4 + $0x8] sm:$0xff]  ;;  %v658_v30 = vld [vmem:[%s3911_s2 + $0x10] sm:$0xff] }
  0x13   :  { %2799 = vmatpush3.bf16.msra.mxu0 %v2796_v13  ;;  %v672_v22 = vld [vmem:[%s3914_s5] sm:$0xff]  ;;  %v657_v28 = vld [vmem:[%s3911_s2 + $0x8] sm:$0xff]  ;;  %v351_v31 = vld [vmem:[%s3910_s1 + $0x10] sm:$0xff] }
  0x14   :  { %v3022_v24 = vpack.c.bf16 %v673_v23, %v672_v22  ;;  %v365_v25 = vld [vmem:[%s3913_s4] sm:$0xff]  ;;  %v350_v29 = vld [vmem:[%s3910_s1 + $0x8] sm:$0xff]  ;;  %v659_v32 = vld [vmem:[%s3911_s2 + $0x18] sm:$0xff] }
  0x15   :  { %v2800_v27 = vpack.c.bf16 %v366_v26, %v365_v25  ;;  %v352_v33 = vld [vmem:[%s3910_s1 + $0x18] sm:$0xff]  ;;  %v660_v34 = vld [vmem:[%s3911_s2 + $0x20] sm:$0xff]  ;;  %v661_v36 = vld [vmem:[%s3911_s2 + $0x28] sm:$0xff] }
  0x16   :  { %93 = vperm.xlu1 %2868, %v50_v14   ;;  %90 = vperm.xlu0 %2867, %v49_v15   ;;  %v353_v35 = vld [vmem:[%s3910_s1 + $0x20] sm:$0xff]  ;;  %v354_v37 = vld [vmem:[%s3910_s1 + $0x28] sm:$0xff]  ;;  %v662_v38 = vld [vmem:[%s3911_s2 + $0x30] sm:$0xff] }
  0x17   :  { %2805 = vmatprep.subr.bf16.mxu0 %v3022_v24  ;;  %2801 = vmatprep.subr.bf16.mxu1 %v2800_v27  ;;  %v355_v39 = vld [vmem:[%s3910_s1 + $0x30] sm:$0xff]  ;;  %v663_v40 = vld [vmem:[%s3911_s2 + $0x38] sm:$0xff]  ;;  %v664_v42 = vld [vmem:[%s3911_s2 + $0x40] sm:$0xff] }
  0x18   :  { %2803 = vmatpush3.bf16.msra.mxu1 %v2800_v27  ;;  %v356_v41 = vld [vmem:[%s3910_s1 + $0x38] sm:$0xff]  ;;  %v357_v43 = vld [vmem:[%s3910_s1 + $0x40] sm:$0xff]  ;;  %v665_v44 = vld [vmem:[%s3911_s2 + $0x48] sm:$0xff] }
  0x19   :  { %v358_v45 = vld [vmem:[%s3910_s1 + $0x48] sm:$0xff]  ;;  %v666_v46 = vld [vmem:[%s3911_s2 + $0x50] sm:$0xff]  ;;  %v667_v48 = vld [vmem:[%s3911_s2 + $0x58] sm:$0xff] }
  0x1a   :  { %99 = vperm.xlu1 %2868, %v52_v16   ;;  %96 = vperm.xlu0 %2867, %v51_v17   ;;  %v359_v47 = vld [vmem:[%s3910_s1 + $0x50] sm:$0xff]  ;;  %v360_v49 = vld [vmem:[%s3910_s1 + $0x58] sm:$0xff]  ;;  %v668_v50 = vld [vmem:[%s3911_s2 + $0x60] sm:$0xff] }
  0x1b   :  { %v361_v51 = vld [vmem:[%s3910_s1 + $0x60] sm:$0xff]  ;;  %v669_v52 = vld [vmem:[%s3911_s2 + $0x68] sm:$0xff]  ;;  %v670_v54 = vld [vmem:[%s3911_s2 + $0x70] sm:$0xff] }
  0x1c   :  { %v362_v53 = vld [vmem:[%s3910_s1 + $0x68] sm:$0xff]  ;;  %v363_v55 = vld [vmem:[%s3910_s1 + $0x70] sm:$0xff]  ;;  %v671_v56 = vld [vmem:[%s3911_s2 + $0x78] sm:$0xff] }
  0x1d   :  { %v364_v57 = vld [vmem:[%s3910_s1 + $0x78] sm:$0xff]  ;;  %v963_v58 = vld [vmem:[%s3915_s6] sm:$0xff]  ;;  %v964_v59 = vld [vmem:[%s3915_s6 + $0x8] sm:$0xff] }
  0x1e   :  { %105 = vperm.xlu1 %2868, %v54_v18   ;;  %102 = vperm.xlu0 %2867, %v53_v19   ;;  %v3127_v60 = vpack.c.bf16 %v964_v59, %v963_v58 }
  0x20   :  { %2817 = vmatprep.subr.bf16.mxu1 %v3127_v60 }
  0x22   :  { %675 = vperm.xlu1 %2868, %v656_v20   ;;  %368 = vperm.xlu0 %2867, %v349_v21  }
  0x26   :  { %678 = vperm.xlu1 %2868, %v657_v28   ;;  %371 = vperm.xlu0 %2867, %v350_v29  }
  0x2a   :  { %681 = vperm.xlu1 %2868, %v658_v30   ;;  %374 = vperm.xlu0 %2867, %v351_v31  }
  0x2e   :  { %684 = vperm.xlu1 %2868, %v659_v32   ;;  %377 = vperm.xlu0 %2867, %v352_v33  }
  0x32   :  { %687 = vperm.xlu1 %2868, %v660_v34   ;;  %380 = vperm.xlu0 %2867, %v353_v35  }
  0x36   :  { %690 = vperm.xlu1 %2868, %v661_v36   ;;  %383 = vperm.xlu0 %2867, %v354_v37   ;;  %v965_v36 = vld [vmem:[%s3915_s6 + $0x10] sm:$0xff]  ;;  %v966_v37 = vld [vmem:[%s3915_s6 + $0x18] sm:$0xff] }
  0x3a   :  { %693 = vperm.xlu1 %2868, %v662_v38   ;;  %386 = vperm.xlu0 %2867, %v355_v39  }
  0x3e   :  { %696 = vperm.xlu1 %2868, %v663_v40   ;;  %389 = vperm.xlu0 %2867, %v356_v41   ;;  %v2820_v40 = vpack.c.bf16 %v966_v37, %v965_v36 }
  0x42   :  { %699 = vperm.xlu1 %2868, %v664_v42   ;;  %392 = vperm.xlu0 %2867, %v357_v43  }
  0x46   :  { %702 = vperm.xlu1 %2868, %v665_v44   ;;  %395 = vperm.xlu0 %2867, %v358_v45  }
  0x4a   :  { %705 = vperm.xlu1 %2868, %v666_v46   ;;  %398 = vperm.xlu0 %2867, %v359_v47  }
  0x4e   :  { %708 = vperm.xlu1 %2868, %v667_v48   ;;  %401 = vperm.xlu0 %2867, %v360_v49  }
  0x52   :  { %711 = vperm.xlu1 %2868, %v668_v50   ;;  %404 = vperm.xlu0 %2867, %v361_v51  }
  0x56   :  { %714 = vperm.xlu1 %2868, %v669_v52   ;;  %407 = vperm.xlu0 %2867, %v362_v53  }
  0x5a   :  { %717 = vperm.xlu1 %2868, %v670_v54   ;;  %410 = vperm.xlu0 %2867, %v363_v55  }
  0x5e   :  { %720 = vperm.xlu1 %2868, %v671_v56   ;;  %413 = vperm.xlu0 %2867, %v364_v57  }
  0x81   :  { %v67_v63 = vpop.permute.xlu1 %66  ;;  %v61_v0 = vpop.permute.xlu0 %60 }
  0x82   :  { %vm107_vm1 = vcmp.eq.s32.totalorder %v61_v0, %v3131_v62  ;;  %vm109_vm2 = vcmp.eq.s32.totalorder %v67_v63, %v3131_v62 }
  0x83   :  { %v2356_v2 = vsel %vm107_vm1, 1.0, %v2894_v1  ;;  %v2358_v6 = vsel %vm109_vm2, 1.0, %v2894_v1 }
  0x84   :  { %2620 = vmatprep.mubr.msk.f32.mxu0 %vm155_vm0, %v2356_v2 }
  0x85   :  { %v70_v3 = vpop.permute.xlu1 %69  ;;  %v64_v4 = vpop.permute.xlu0 %63 }
  0x86   :  { %vm108_vm3 = vcmp.eq.s32.totalorder %v64_v4, %v3131_v62  ;;  %vm110_vm4 = vcmp.eq.s32.totalorder %v70_v3, %v3131_v62 }
  0x87   :  { %v2357_v5 = vsel %vm108_vm3, 1.0, %v2894_v1  ;;  %v2359_v9 = vsel %vm110_vm4, 1.0, %v2894_v1 }
  0x88   :  { %2621 = vmatmul.mubr.msk.f32.vlgmr.msra.gmra.mrb[0].mxu0 %vm155_vm0, %v2357_v5 }
  0x89   :  { %v76_v7 = vpop.permute.xlu1 %75  ;;  %2623 = vmatprep.mubr.msk.f32.mxu0 %vm155_vm0, %v2358_v6  ;;  %v73_v8 = vpop.permute.xlu0 %72  ;;  %2807 = vmatpush3.bf16.msra.mxu0 %v3022_v24 }
  0x8a   :  { %vm111_vm5 = vcmp.eq.s32.totalorder %v73_v8, %v3131_v62  ;;  %vm112_vm6 = vcmp.eq.s32.totalorder %v76_v7, %v3131_v62 }
  0x8b   :  { %v2360_v10 = vsel %vm111_vm5, 1.0, %v2894_v1  ;;  %v2361_v13 = vsel %vm112_vm6, 1.0, %v2894_v1 }
  0x8c   :  { %2624 = vmatmul.mubr.msk.f32.gmra.mrb[2].mxu0 %vm155_vm0, %v2359_v9 }
  0x8d   :  { %v82_v11 = vpop.permute.xlu1 %81  ;;  %2626 = vmatprep.mubr.msk.f32.mxu0 %vm155_vm0, %v2360_v10  ;;  %v79_v12 = vpop.permute.xlu0 %78 }
  0x8e   :  { %vm113_vm7 = vcmp.eq.s32.totalorder %v79_v12, %v3131_v62  ;;  %vm114_vm8 = vcmp.eq.s32.totalorder %v82_v11, %v3131_v62 }
  0x8f   :  { %v2362_v14 = vsel %vm113_vm7, 1.0, %v2894_v1  ;;  %v2363_v17 = vsel %vm114_vm8, 1.0, %v2894_v1 }
  0x90   :  { %2627 = vmatmul.mubr.msk.f32.gmra.mrb[4].mxu0 %vm155_vm0, %v2361_v13 }
  0x91   :  { %v88_v15 = vpop.permute.xlu1 %87  ;;  %2629 = vmatprep.mubr.msk.f32.mxu0 %vm155_vm0, %v2362_v14  ;;  %v85_v16 = vpop.permute.xlu0 %84 }
  0x92   :  { %vm115_vm9 = vcmp.eq.s32.totalorder %v85_v16, %v3131_v62  ;;  %vm116_vm10 = vcmp.eq.s32.totalorder %v88_v15, %v3131_v62 }
  0x93   :  { %v2364_v18 = vsel %vm115_vm9, 1.0, %v2894_v1  ;;  %v2365_v21 = vsel %vm116_vm10, 1.0, %v2894_v1 }
  0x94   :  { %2630 = vmatmul.mubr.msk.f32.gmra.mrb[6].mxu0 %vm155_vm0, %v2363_v17 }
  0x95   :  { %v94_v19 = vpop.permute.xlu1 %93  ;;  %2632 = vmatprep.mubr.msk.f32.mxu0 %vm155_vm0, %v2364_v18  ;;  %v91_v20 = vpop.permute.xlu0 %90 }
  0x96   :  { %vm117_vm11 = vcmp.eq.s32.totalorder %v91_v20, %v3131_v62  ;;  %vm118_vm12 = vcmp.eq.s32.totalorder %v94_v19, %v3131_v62 }
  0x97   :  { %v2366_v22 = vsel %vm117_vm11, 1.0, %v2894_v1  ;;  %v2367_v25 = vsel %vm118_vm12, 1.0, %v2894_v1 }
  0x98   :  { %2633 = vmatmul.mubr.msk.f32.gmra.mrb[8].mxu0 %vm155_vm0, %v2365_v21 }
  0x99   :  { %v100_v23 = vpop.permute.xlu1 %99  ;;  %2635 = vmatprep.mubr.msk.f32.mxu0 %vm155_vm0, %v2366_v22  ;;  %v97_v24 = vpop.permute.xlu0 %96 }
  0x9a   :  { %vm119_vm13 = vcmp.eq.s32.totalorder %v97_v24, %v3131_v62  ;;  %vm120_vm14 = vcmp.eq.s32.totalorder %v100_v23, %v3131_v62 }
  0x9b   :  { %v2368_v26 = vsel %vm119_vm13, 1.0, %v2894_v1  ;;  %v2369_v29 = vsel %vm120_vm14, 1.0, %v2894_v1 }
  0x9c   :  { %2636 = vmatmul.mubr.msk.f32.gmra.mrb[10].mxu0 %vm155_vm0, %v2367_v25 }
  0x9d   :  { %v106_v27 = vpop.permute.xlu1 %105  ;;  %2638 = vmatprep.mubr.msk.f32.mxu0 %vm155_vm0, %v2368_v26  ;;  %v103_v28 = vpop.permute.xlu0 %102 }
  0x9e   :  { %vm121_vm15 = vcmp.eq.s32.totalorder %v103_v28, %v3131_v62  ;;  %vm122_vm1 = vcmp.eq.s32.totalorder %v106_v27, %v3131_v62 }
  0x9f   :  { %v2370_v30 = vsel %vm121_vm15, 1.0, %v2894_v1  ;;  %v2371_v33 = vsel %vm122_vm1, 1.0, %v2894_v1 }
  0xa0   :  { %2639 = vmatmul.mubr.msk.f32.gmra.mrb[12].mxu0 %vm155_vm0, %v2369_v29 }
  0xa1   :  { %v676_v31 = vpop.permute.xlu1 %675  ;;  %2641 = vmatprep.mubr.msk.f32.mxu0 %vm155_vm0, %v2370_v30  ;;  %v369_v32 = vpop.permute.xlu0 %368 }
  0xa2   :  { %vm722_vm2 = vcmp.eq.s32.totalorder %v676_v31, %v3131_v62  ;;  %vm415_vm3 = vcmp.eq.s32.totalorder %v369_v32, %v3131_v62 }
  0xa3   :  { %v2420_v34 = vsel %vm722_vm2, 1.0, %v2894_v1  ;;  %v2388_v35 = vsel %vm415_vm3, 1.0, %v2894_v1 }
  0xa4   :  { %2642 = vmatmul.mubr.msk.f32.gmra.mrb[14].mxu0 %vm155_vm0, %v2371_v33  ;;  %2648 = vmatprep.mubr.msk.f32.mxu1 %vm155_vm0, %v2388_v35 }
  0xa5   :  { %v679_v38 = vpop.permute.xlu1 %678  ;;  %2676 = vmatprep.mubr.msk.f32.mxu0 %vm155_vm0, %v2420_v34  ;;  %v372_v39 = vpop.permute.xlu0 %371 }
  0xa6   :  { %vm723_vm4 = vcmp.eq.s32.totalorder %v679_v38, %v3131_v62  ;;  %vm416_vm5 = vcmp.eq.s32.totalorder %v372_v39, %v3131_v62  ;;  %v967_v38 = vld [vmem:[%s3916_s7] sm:$0xff]  ;;  %v968_v39 = vld [vmem:[%s3916_s7 + $0x8] sm:$0xff] }
  0xa7   :  { %v2421_v41 = vsel %vm723_vm4, 1.0, %v2894_v1  ;;  %v2389_v42 = vsel %vm416_vm5, 1.0, %v2894_v1 }
  0xa8   :  { %2649 = vmatmul.mubr.msk.f32.vlgmr.msra.gmra.mrb[0].mxu1 %vm155_vm0, %v2389_v42  ;;  %2677 = vmatmul.mubr.msk.f32.vlgmr.msra.gmra.mrb[16].mxu0 %vm155_vm0, %v2421_v41  ;;  %v2808_v41 = vpack.c.bf16 %v968_v39, %v967_v38 }
  0xa9   :  { %v682_v43 = vpop.permute.xlu1 %681  ;;  %v375_v44 = vpop.permute.xlu0 %374  ;;  %2819 = vmatpush3.bf16.msra.mxu1 %v3127_v60 }
  0xaa   :  { %vm724_vm6 = vcmp.eq.s32.totalorder %v682_v43, %v3131_v62  ;;  %vm417_vm7 = vcmp.eq.s32.totalorder %v375_v44, %v3131_v62  ;;  %2821 = vmatprep.subr.bf16.mxu1 %v2820_v40  ;;  %2809 = vmatprep.subr.bf16.mxu0 %v2808_v41  ;;  %v969_v43 = vld [vmem:[%s3916_s7 + $0x10] sm:$0xff]  ;;  %v970_v44 = vld [vmem:[%s3916_s7 + $0x18] sm:$0xff] }
  0xab   :  { %v2422_v45 = vsel %vm724_vm6, 1.0, %v2894_v1  ;;  %v2390_v46 = vsel %vm417_vm7, 1.0, %v2894_v1  ;;  %2811 = vmatpush3.bf16.msra.mxu0 %v2808_v41 }
  0xac   :  { %2651 = vmatprep.mubr.msk.f32.mxu1 %vm155_vm0, %v2390_v46  ;;  %2679 = vmatprep.mubr.msk.f32.mxu0 %vm155_vm0, %v2422_v45  ;;  %v2812_v45 = vpack.c.bf16 %v970_v44, %v969_v43  ;;  %v973_v46 = vld [vmem:[%s3917_s8 + $0x10] sm:$0xff] }
  0xad   :  { %v685_v47 = vpop.permute.xlu1 %684  ;;  %v378_v48 = vpop.permute.xlu0 %377  ;;  %2823 = vmatpush3.bf16.msra.mxu1 %v2820_v40  ;;  %v971_v40 = vld [vmem:[%s3917_s8] sm:$0xff] }
  0xae   :  { %vm725_vm8 = vcmp.eq.s32.totalorder %v685_v47, %v3131_v62  ;;  %vm418_vm9 = vcmp.eq.s32.totalorder %v378_v48, %v3131_v62  ;;  %2813 = vmatprep.subr.bf16.mxu0 %v2812_v45  ;;  %v974_v47 = vld [vmem:[%s3917_s8 + $0x18] sm:$0xff] }
  0xaf   :  { %v2423_v49 = vsel %vm725_vm8, 1.0, %v2894_v1  ;;  %v2391_v50 = vsel %vm418_vm9, 1.0, %v2894_v1  ;;  %2815 = vmatpush3.bf16.msra.mxu0 %v2812_v45 }
  0xb0   :  { %2652 = vmatmul.mubr.msk.f32.gmra.mrb[2].mxu1 %vm155_vm0, %v2391_v50  ;;  %2680 = vmatmul.mubr.msk.f32.gmra.mrb[18].mxu0 %vm155_vm0, %v2423_v49 }
  0xb1   :  { %v688_v51 = vpop.permute.xlu1 %687  ;;  %v381_v52 = vpop.permute.xlu0 %380 }
  0xb2   :  { %vm726_vm10 = vcmp.eq.s32.totalorder %v688_v51, %v3131_v62  ;;  %vm419_vm11 = vcmp.eq.s32.totalorder %v381_v52, %v3131_v62  ;;  %v2828_v51 = vpack.c.bf16 %v974_v47, %v973_v46 }
  0xb3   :  { %v2424_v53 = vsel %vm726_vm10, 1.0, %v2894_v1  ;;  %v2392_v54 = vsel %vm419_vm11, 1.0, %v2894_v1 }
  0xb4   :  { %2654 = vmatprep.mubr.msk.f32.mxu1 %vm155_vm0, %v2392_v54  ;;  %2682 = vmatprep.mubr.msk.f32.mxu0 %vm155_vm0, %v2424_v53 }
  0xb5   :  { %v691_v55 = vpop.permute.xlu1 %690  ;;  %v384_v56 = vpop.permute.xlu0 %383 }
  0xb6   :  { %vm727_vm12 = vcmp.eq.s32.totalorder %v691_v55, %v3131_v62  ;;  %vm420_vm13 = vcmp.eq.s32.totalorder %v384_v56, %v3131_v62 }
  0xb7   :  { %v2425_v57 = vsel %vm727_vm12, 1.0, %v2894_v1  ;;  %v2393_v58 = vsel %vm420_vm13, 1.0, %v2894_v1 }
  0xb8   :  { %2655 = vmatmul.mubr.msk.f32.gmra.mrb[4].mxu1 %vm155_vm0, %v2393_v58  ;;  %2683 = vmatmul.mubr.msk.f32.gmra.mrb[20].mxu0 %vm155_vm0, %v2425_v57 }
  0xb9   :  { %v694_v59 = vpop.permute.xlu1 %693  ;;  %v387_v60 = vpop.permute.xlu0 %386 }
  0xba   :  { %vm728_vm14 = vcmp.eq.s32.totalorder %v694_v59, %v3131_v62  ;;  %vm421_vm15 = vcmp.eq.s32.totalorder %v387_v60, %v3131_v62 }
  0xbb   :  { %v2426_v63 = vsel %vm728_vm14, 1.0, %v2894_v1  ;;  %v2394_v0 = vsel %vm421_vm15, 1.0, %v2894_v1 }
  0xbc   :  { %2657 = vmatprep.mubr.msk.f32.mxu1 %vm155_vm0, %v2394_v0  ;;  %2685 = vmatprep.mubr.msk.f32.mxu0 %vm155_vm0, %v2426_v63 }
  0xbd   :  { %v697_v2 = vpop.permute.xlu1 %696  ;;  %v390_v3 = vpop.permute.xlu0 %389 }
  0xbe   :  { %vm729_vm1 = vcmp.eq.s32.totalorder %v697_v2, %v3131_v62  ;;  %vm422_vm2 = vcmp.eq.s32.totalorder %v390_v3, %v3131_v62 }
  0xbf   :  { %v2427_v4 = vsel %vm729_vm1, 1.0, %v2894_v1  ;;  %v2395_v5 = vsel %vm422_vm2, 1.0, %v2894_v1 }
  0xc0   :  { %2658 = vmatmul.mubr.msk.f32.gmra.mrb[6].mxu1 %vm155_vm0, %v2395_v5  ;;  %2686 = vmatmul.mubr.msk.f32.gmra.mrb[22].mxu0 %vm155_vm0, %v2427_v4 }
  0xc1   :  { %v700_v6 = vpop.permute.xlu1 %699  ;;  %v393_v7 = vpop.permute.xlu0 %392 }
  0xc2   :  { %vm730_vm3 = vcmp.eq.s32.totalorder %v700_v6, %v3131_v62  ;;  %vm423_vm4 = vcmp.eq.s32.totalorder %v393_v7, %v3131_v62 }
  0xc3   :  { %v2428_v8 = vsel %vm730_vm3, 1.0, %v2894_v1  ;;  %v2396_v9 = vsel %vm423_vm4, 1.0, %v2894_v1  ;;  %vm1946_vm4 = vcmask 130112  }
  0xc4   :  { %2660 = vmatprep.mubr.msk.f32.mxu1 %vm155_vm0, %v2396_v9  ;;  %2688 = vmatprep.mubr.msk.f32.mxu0 %vm155_vm0, %v2428_v8 }
  0xc5   :  { %v703_v10 = vpop.permute.xlu1 %702  ;;  %v396_v11 = vpop.permute.xlu0 %395 }
  0xc6   :  { %vm731_vm5 = vcmp.eq.s32.totalorder %v703_v10, %v3131_v62  ;;  %vm424_vm6 = vcmp.eq.s32.totalorder %v396_v11, %v3131_v62 }
  0xc7   :  { %v2429_v12 = vsel %vm731_vm5, 1.0, %v2894_v1  ;;  %v2397_v13 = vsel %vm424_vm6, 1.0, %v2894_v1  ;;  %vm1953_vm5 = vcmask 195712   ;;  %vm1960_vm6 = vcmask 261312  }
  0xc8   :  { %2661 = vmatmul.mubr.msk.f32.gmra.mrb[8].mxu1 %vm155_vm0, %v2397_v13  ;;  %2689 = vmatmul.mubr.msk.f32.gmra.mrb[24].mxu0 %vm155_vm0, %v2429_v12 }
  0xc9   :  { %v706_v14 = vpop.permute.xlu1 %705  ;;  %v399_v15 = vpop.permute.xlu0 %398 }
  0xca   :  { %vm732_vm7 = vcmp.eq.s32.totalorder %v706_v14, %v3131_v62  ;;  %vm425_vm8 = vcmp.eq.s32.totalorder %v399_v15, %v3131_v62 }
  0xcb   :  { %v2430_v16 = vsel %vm732_vm7, 1.0, %v2894_v1  ;;  %v2398_v17 = vsel %vm425_vm8, 1.0, %v2894_v1  ;;  %vm1967_vm7 = vcmask 326912   ;;  %vm1974_vm8 = vcmask 392512  }
  0xcc   :  { %2663 = vmatprep.mubr.msk.f32.mxu1 %vm155_vm0, %v2398_v17  ;;  %2691 = vmatprep.mubr.msk.f32.mxu0 %vm155_vm0, %v2430_v16 }
  0xcd   :  { %v709_v18 = vpop.permute.xlu1 %708  ;;  %v402_v19 = vpop.permute.xlu0 %401 }
  0xce   :  { %vm733_vm9 = vcmp.eq.s32.totalorder %v709_v18, %v3131_v62  ;;  %vm426_vm10 = vcmp.eq.s32.totalorder %v402_v19, %v3131_v62 }
  0xcf   :  { %v2431_v20 = vsel %vm733_vm9, 1.0, %v2894_v1  ;;  %v2399_v21 = vsel %vm426_vm10, 1.0, %v2894_v1  ;;  %vm1981_vm9 = vcmask 458112   ;;  %vm1988_vm10 = vcmask 523712  }
  0xd0   :  { %2664 = vmatmul.mubr.msk.f32.gmra.mrb[10].mxu1 %vm155_vm0, %v2399_v21  ;;  %2692 = vmatmul.mubr.msk.f32.gmra.mrb[26].mxu0 %vm155_vm0, %v2431_v20 }
  0xd1   :  { %v712_v22 = vpop.permute.xlu1 %711  ;;  %v405_v23 = vpop.permute.xlu0 %404 }
  0xd2   :  { %vm734_vm11 = vcmp.eq.s32.totalorder %v712_v22, %v3131_v62  ;;  %vm427_vm12 = vcmp.eq.s32.totalorder %v405_v23, %v3131_v62 }
  0xd3   :  { %v2432_v24 = vsel %vm734_vm11, 1.0, %v2894_v1  ;;  %v2400_v25 = vsel %vm427_vm12, 1.0, %v2894_v1  ;;  %vm1995_vm11 = vcmask 589312   ;;  %vm2002_vm12 = vcmask 654912  }
  0xd4   :  { %2666 = vmatprep.mubr.msk.f32.mxu1 %vm155_vm0, %v2400_v25  ;;  %2694 = vmatprep.mubr.msk.f32.mxu0 %vm155_vm0, %v2432_v24 }
  0xd5   :  { %v715_v26 = vpop.permute.xlu1 %714  ;;  %v408_v27 = vpop.permute.xlu0 %407 }
  0xd6   :  { %vm735_vm13 = vcmp.eq.s32.totalorder %v715_v26, %v3131_v62  ;;  %vm428_vm14 = vcmp.eq.s32.totalorder %v408_v27, %v3131_v62 }
  0xd7   :  { %v2433_v28 = vsel %vm735_vm13, 1.0, %v2894_v1  ;;  %v2401_v29 = vsel %vm428_vm14, 1.0, %v2894_v1  ;;  %vm2009_vm13 = vcmask 720512   ;;  %vm2016_vm14 = vcmask 786112  }
  0xd8   :  { %2667 = vmatmul.mubr.msk.f32.gmra.mrb[12].mxu1 %vm155_vm0, %v2401_v29  ;;  %2695 = vmatmul.mubr.msk.f32.gmra.mrb[28].mxu0 %vm155_vm0, %v2433_v28 }
  0xd9   :  { %v718_v30 = vpop.permute.xlu1 %717  ;;  %v411_v31 = vpop.permute.xlu0 %410 }
  0xda   :  { %vm736_vm15 = vcmp.eq.s32.totalorder %v718_v30, %v3131_v62  ;;  %vm429_vm1 = vcmp.eq.s32.totalorder %v411_v31, %v3131_v62 }
  0xdb   :  { %v2434_v32 = vsel %vm736_vm15, 1.0, %v2894_v1  ;;  %v2402_v33 = vsel %vm429_vm1, 1.0, %v2894_v1  ;;  %vm2023_vm15 = vcmask 851712   ;;  %vm2030_vm1 = vcmask 917312  }
  0xdc   :  { %2669 = vmatprep.mubr.msk.f32.mxu1 %vm155_vm0, %v2402_v33  ;;  %2697 = vmatprep.mubr.msk.f32.mxu0 %vm155_vm0, %v2434_v32 }
  0xdd   :  { %v721_v34 = vpop.permute.xlu1 %720  ;;  %v414_v35 = vpop.permute.xlu0 %413 }
  0xde   :  { %vm737_vm2 = vcmp.eq.s32.totalorder %v721_v34, %v3131_v62  ;;  %vm430_vm3 = vcmp.eq.s32.totalorder %v414_v35, %v3131_v62 }
  0xdf   :  { %v2435_v36 = vsel %vm737_vm2, 1.0, %v2894_v1  ;;  %v2403_v37 = vsel %vm430_vm3, 1.0, %v2894_v1  ;;  %v972_v1 = vld [vmem:[%s3917_s8 + $0x8] sm:$0xff]  ;;  %vm2037_vm2 = vcmask 982912   ;;  %vm2044_vm3 = vcmask 1048512  }
  0xe0   :  { %2670 = vmatmul.mubr.msk.f32.gmra.mrb[14].mxu1 %vm155_vm0, %v2403_v37  ;;  %2698 = vmatmul.mubr.msk.f32.gmra.mrb[30].mxu0 %vm155_vm0, %v2435_v36  ;;  %v2824_v42 = vpack.c.bf16 %v972_v1, %v971_v40  ;;  %vm1009_vm0 = vcmask 261120  }
  0xe2   :  { %2825 = vmatprep.subr.bf16.mxu1 %v2824_v42 }
 0x15b   :  { %v2622_v48 = vpop.f32.mrb[0].mxu0 }
 0x15c   :  { %v270_v49 = vpop.f32.mrb[1].mxu0  ;;  %v1730_v50 = vmul.f32 %v2622_v48, %v2622_v48 }
 0x15d   :  { %2740 = vmatprep.mubr.msk.f32.mxu1 %vm1009_vm0, %v270_v49  ;;  %v1729_v16 = vmul.f32 %v270_v49, %v270_v49 }
 0x15e   :  { %2741 = vmatmul.mubr.msk.f32.vlgmr.msra.gmra.mrb[16].mxu1 %vm1009_vm0, %v2622_v48  ;;  %v1748_v52 = vsel %vm1009_vm0, %v1730_v50, 0.0 }
 0x15f   :  { %1749 = vadd.xlane.f32.xlu0 %v1748_v52  ;;  %v2625_v53 = vpop.f32.mrb[2].mxu0  ;;  %2827 = vmatpush3.bf16.msra.mxu1 %v2824_v42  ;;  %v1745_v20 = vsel %vm1009_vm0, %v1729_v16, 0.0 }
 0x160   :  { %v3312_v54 = vpop.f32.mrb[3].mxu0  ;;  %2829 = vmatprep.subr.bf16.mxu1 %v2828_v51  ;;  %v1732_v19 = vmul.f32 %v2625_v53, %v2625_v53 }
 0x161   :  { %2743 = vmatprep.mubr.msk.f32.mxu1 %vm1009_vm0, %v3312_v54  ;;  %v1731_v32 = vmul.f32 %v3312_v54, %v3312_v54 }
 0x162   :  { %2744 = vmatmul.mubr.msk.f32.gmra.mrb[18].mxu1 %vm1009_vm0, %v2625_v53  ;;  %v1754_v23 = vsel %vm1009_vm0, %v1732_v19, 0.0 }
 0x163   :  { %v3317_v55 = vpop.f32.mrb[4].mxu0  ;;  %2831 = vmatpush3.bf16.msra.mxu1 %v2828_v51  ;;  %v1751_v35 = vsel %vm1009_vm0, %v1731_v32, 0.0 }
 0x164   :  { %v3319_v56 = vpop.f32.mrb[5].mxu0  ;;  %v1734_v45 = vmul.f32 %v3317_v55, %v3317_v55 }
 0x165   :  { %2746 = vmatprep.mubr.msk.f32.mxu1 %vm1009_vm0, %v3319_v56  ;;  %v1733_v24 = vmul.f32 %v3319_v56, %v3319_v56 }
 0x166   :  { %2747 = vmatmul.mubr.msk.f32.gmra.mrb[20].mxu1 %vm1009_vm0, %v3317_v55 }
 0x167   :  { %v3325_v57 = vpop.f32.mrb[6].mxu0  ;;  %v1757_v34 = vsel %vm1009_vm0, %v1733_v24, 0.0 }
 0x168   :  { %v3327_v58 = vpop.f32.mrb[7].mxu0 }
 0x169   :  { %2749 = vmatprep.mubr.msk.f32.mxu1 %vm1009_vm0, %v3327_v58 }
 0x16a   :  { %2750 = vmatmul.mubr.msk.f32.gmra.mrb[22].mxu1 %vm1009_vm0, %v3325_v57 }
 0x16b   :  { %v3333_v59 = vpop.f32.mrb[8].mxu0 }
 0x16c   :  { %v3335_v60 = vpop.f32.mrb[9].mxu0 }
 0x16d   :  { %2752 = vmatprep.mubr.msk.f32.mxu1 %vm1009_vm0, %v3335_v60 }
 0x16e   :  { %2753 = vmatmul.mubr.msk.f32.gmra.mrb[24].mxu1 %vm1009_vm0, %v3333_v59 }
 0x16f   :  { %v3341_v63 = vpop.f32.mrb[10].mxu0 }
 0x170   :  { %v3343_v0 = vpop.f32.mrb[11].mxu0 }
 0x171   :  { %2755 = vmatprep.mubr.msk.f32.mxu1 %vm1009_vm0, %v3343_v0 }
 0x172   :  { %2756 = vmatmul.mubr.msk.f32.gmra.mrb[26].mxu1 %vm1009_vm0, %v3341_v63 }
 0x173   :  { %v3349_v2 = vpop.f32.mrb[12].mxu0 }
 0x174   :  { %v3351_v3 = vpop.f32.mrb[13].mxu0 }
 0x175   :  { %2758 = vmatprep.mubr.msk.f32.mxu1 %vm1009_vm0, %v3351_v3 }
 0x176   :  { %2759 = vmatmul.mubr.msk.f32.gmra.mrb[28].mxu1 %vm1009_vm0, %v3349_v2 }
 0x177   :  { %v3357_v4 = vpop.f32.mrb[14].mxu0 }
 0x178   :  { %v3359_v5 = vpop.f32.mrb[15].mxu0 }
 0x179   :  { %2761 = vmatprep.mubr.msk.f32.mxu1 %vm1009_vm0, %v3359_v5 }
 0x17a   :  { %2762 = vmatmul.mubr.msk.f32.gmra.mrb[30].mxu1 %vm1009_vm0, %v3357_v4 }
 0x17b   :  { %v2650_v6 = vpop.f32.mrb[0].mxu1  ;;  %v3365_v7 = vpop.f32.mrb[16].mxu0 }
 0x17c   :  { %v978_v8 = vmul.f32 %v2650_v6, %v2622_v48  ;;  %v577_v9 = vpop.f32.mrb[1].mxu1  ;;  %v3367_v10 = vpop.f32.mrb[17].mxu0  ;;  %v1794_v11 = vmul.f32 %v2650_v6, %v2650_v6  ;;  %v1735_v48 = vmul.f32 %v3327_v58, %v3327_v58 }
 0x17d   :  { %v977_v12 = vmul.f32 %v577_v9, %v270_v49  ;;  %2708 = vmatprep.mubr.msk.f32.mxu0 %vm1009_vm0, %v577_v9  ;;  %2772 = vmatprep.mubr.msk.f32.mxu1 %vm1009_vm0, %v3367_v10  ;;  %v1793_v13 = vmul.f32 %v577_v9, %v577_v9  ;;  %v1760_v49 = vsel %vm1009_vm0, %v1734_v45, 0.0 }
 0x17e   :  { %v3373_v14 = vmul.f32 %v3365_v7, %v978_v8  ;;  %2709 = vmatmul.mubr.msk.f32.vlgmr.msra.gmra.mrb[32].mxu0 %vm1009_vm0, %v2650_v6  ;;  %2773 = vmatmul.mubr.msk.f32.vlgmr.msra.gmra.mrb[16].mxu1 %vm1009_vm0, %v3365_v7  ;;  %v1812_v15 = vsel %vm1009_vm0, %v1794_v11, 0.0 }
 0x17f   :  { %v3380_v17 = vmul.f32 %v977_v12, %v3367_v10  ;;  %1813 = vadd.xlane.f32.xlu1 %v1812_v15  ;;  %v1809_v18 = vsel %vm1009_vm0, %v1793_v13, 0.0  ;;  %v1736_v12 = vmul.f32 %v3325_v57, %v3325_v57  ;;  %v1737_v15 = vmul.f32 %v3335_v60, %v3335_v60 }
 0x180   :  { %1810 = vadd.xlane.f32.xlu0 %v1809_v18 }
 0x181   :  { %v1766_v16 = vsel %vm1009_vm0, %v1736_v12, 0.0 }
 0x183   :  { %v3384_v21 = vpop.f32.mrb[18].mxu0  ;;  %1746 = vadd.xlane.f32.xlu1 %v1745_v20  ;;  %v2653_v22 = vpop.f32.mrb[2].mxu1 }
 0x184   :  { %v980_v25 = vmul.f32 %v2653_v22, %v2625_v53  ;;  %v3389_v26 = vpop.f32.mrb[19].mxu0  ;;  %1755 = vadd.xlane.f32.xlu0 %v1754_v23  ;;  %v587_v27 = vpop.f32.mrb[3].mxu1  ;;  %v1796_v28 = vmul.f32 %v2653_v22, %v2653_v22  ;;  %v1763_v53 = vsel %vm1009_vm0, %v1735_v48, 0.0 }
 0x185   :  { %v979_v29 = vmul.f32 %v587_v27, %v3312_v54  ;;  %2711 = vmatprep.mubr.msk.f32.mxu0 %vm1009_vm0, %v587_v27  ;;  %2775 = vmatprep.mubr.msk.f32.mxu1 %vm1009_vm0, %v3389_v26  ;;  %v1795_v36 = vmul.f32 %v587_v27, %v587_v27 }
 0x186   :  { %v3396_v30 = vmul.f32 %v3384_v21, %v980_v25  ;;  %2712 = vmatmul.mubr.msk.f32.gmra.mrb[34].mxu0 %vm1009_vm0, %v2653_v22  ;;  %2776 = vmatmul.mubr.msk.f32.gmra.mrb[18].mxu1 %vm1009_vm0, %v3384_v21  ;;  %v1818_v31 = vsel %vm1009_vm0, %v1796_v28, 0.0  ;;  %v1769_v22 = vsel %vm1009_vm0, %v1737_v15, 0.0 }
 0x187   :  { %v3405_v33 = vmul.f32 %v979_v29, %v3389_v26  ;;  %1819 = vadd.xlane.f32.xlu1 %v1818_v31  ;;  %v1815_v44 = vsel %vm1009_vm0, %v1795_v36, 0.0  ;;  %v1738_v31 = vmul.f32 %v3333_v59, %v3333_v59 }
 0x188   :  { %1758 = vadd.xlane.f32.xlu0 %v1757_v34  ;;  %v1739_v34 = vmul.f32 %v3343_v0, %v3343_v0 }
 0x18b   :  { %v3409_v37 = vpop.f32.mrb[20].mxu0  ;;  %1752 = vadd.xlane.f32.xlu1 %v1751_v35  ;;  %v2656_v38 = vpop.f32.mrb[4].mxu1  ;;  %v1772_v35 = vsel %vm1009_vm0, %v1738_v31, 0.0 }
 0x18c   :  { %v982_v39 = vmul.f32 %v2656_v38, %v3317_v55  ;;  %v597_v40 = vpop.f32.mrb[5].mxu1  ;;  %v3412_v41 = vpop.f32.mrb[21].mxu0  ;;  %v1798_v50 = vmul.f32 %v2656_v38, %v2656_v38 }
 0x18d   :  { %v981_v1 = vmul.f32 %v597_v40, %v3319_v56  ;;  %2714 = vmatprep.mubr.msk.f32.mxu0 %vm1009_vm0, %v597_v40  ;;  %2778 = vmatprep.mubr.msk.f32.mxu1 %vm1009_vm0, %v3412_v41  ;;  %v1797_v42 = vmul.f32 %v597_v40, %v597_v40  ;;  %v1775_v40 = vsel %vm1009_vm0, %v1739_v34, 0.0 }
 0x18e   :  { %v3419_v43 = vmul.f32 %v3409_v37, %v982_v39  ;;  %2715 = vmatmul.mubr.msk.f32.gmra.mrb[36].mxu0 %vm1009_vm0, %v2656_v38  ;;  %2779 = vmatmul.mubr.msk.f32.gmra.mrb[20].mxu1 %vm1009_vm0, %v3409_v37  ;;  %v1824_v11 = vsel %vm1009_vm0, %v1798_v50, 0.0 }
 0x18f   :  { %v3428_v46 = vmul.f32 %v981_v1, %v3412_v41  ;;  %1816 = vadd.xlane.f32.xlu1 %v1815_v44  ;;  %v1821_v47 = vsel %vm1009_vm0, %v1797_v42, 0.0 }
 0x190   :  { %1822 = vadd.xlane.f32.xlu0 %v1821_v47 }
 0x193   :  { %v3434_v51 = vpop.f32.mrb[22].mxu0  ;;  %1761 = vadd.xlane.f32.xlu1 %v1760_v49  ;;  %v2659_v52 = vpop.f32.mrb[6].mxu1  ;;  %v1740_v49 = vmul.f32 %v3341_v63, %v3341_v63 }
 0x194   :  { %v984_v54 = vmul.f32 %v2659_v52, %v3325_v57  ;;  %v3438_v55 = vpop.f32.mrb[23].mxu0  ;;  %1764 = vadd.xlane.f32.xlu0 %v1763_v53  ;;  %v607_v56 = vpop.f32.mrb[7].mxu1  ;;  %v1800_v18 = vmul.f32 %v2659_v52, %v2659_v52 }
 0x195   :  { %v983_v6 = vmul.f32 %v607_v56, %v3327_v58  ;;  %2717 = vmatprep.mubr.msk.f32.mxu0 %vm1009_vm0, %v607_v56  ;;  %2781 = vmatprep.mubr.msk.f32.mxu1 %vm1009_vm0, %v3438_v55  ;;  %v1799_v8 = vmul.f32 %v607_v56, %v607_v56  ;;  %v1778_v53 = vsel %vm1009_vm0, %v1740_v49, 0.0 }
 0x196   :  { %v3445_v9 = vmul.f32 %v3434_v51, %v984_v54  ;;  %2718 = vmatmul.mubr.msk.f32.gmra.mrb[38].mxu0 %vm1009_vm0, %v2659_v52  ;;  %2782 = vmatmul.mubr.msk.f32.gmra.mrb[22].mxu1 %vm1009_vm0, %v3434_v51  ;;  %v1830_v29 = vsel %vm1009_vm0, %v1800_v18, 0.0  ;;  %v1741_v52 = vmul.f32 %v3351_v3, %v3351_v3 }
 0x197   :  { %v3454_v58 = vmul.f32 %v983_v6, %v3438_v55  ;;  %1825 = vadd.xlane.f32.xlu1 %v1824_v11  ;;  %v1827_v13 = vsel %vm1009_vm0, %v1799_v8, 0.0 }
 0x198   :  { %1828 = vadd.xlane.f32.xlu0 %v1827_v13  ;;  %v1781_v8 = vsel %vm1009_vm0, %v1741_v52, 0.0  ;;  %v1857_v52 = vmul.f32 %v3367_v10, %v3367_v10  ;;  %v1864_v10 = vmul.f32 %v3434_v51, %v3434_v51 }
 0x19b   :  { %v3460_v19 = vpop.f32.mrb[24].mxu0  ;;  %1767 = vadd.xlane.f32.xlu1 %v1766_v16  ;;  %v2662_v20 = vpop.f32.mrb[8].mxu1 }
 0x19c   :  { %v986_v57 = vmul.f32 %v2662_v20, %v3333_v59  ;;  %v3464_v23 = vpop.f32.mrb[25].mxu0  ;;  %1770 = vadd.xlane.f32.xlu0 %v1769_v22  ;;  %v617_v24 = vpop.f32.mrb[9].mxu1  ;;  %v1802_v36 = vmul.f32 %v2662_v20, %v2662_v20 }
 0x19d   :  { %v985_v25 = vmul.f32 %v617_v24, %v3335_v60  ;;  %2720 = vmatprep.mubr.msk.f32.mxu0 %vm1009_vm0, %v617_v24  ;;  %2784 = vmatprep.mubr.msk.f32.mxu1 %vm1009_vm0, %v3464_v23  ;;  %v1801_v27 = vmul.f32 %v617_v24, %v617_v24 }
 0x19e   :  { %v3471_v28 = vmul.f32 %v3460_v19, %v986_v57  ;;  %2721 = vmatmul.mubr.msk.f32.gmra.mrb[40].mxu0 %vm1009_vm0, %v2662_v20  ;;  %2785 = vmatmul.mubr.msk.f32.gmra.mrb[24].mxu1 %vm1009_vm0, %v3460_v19  ;;  %v1836_v48 = vsel %vm1009_vm0, %v1802_v36, 0.0  ;;  %v1742_v20 = vmul.f32 %v3349_v2, %v3349_v2 }
 0x19f   :  { %v3480_v60 = vmul.f32 %v985_v25, %v3464_v23  ;;  %1831 = vadd.xlane.f32.xlu1 %v1830_v29  ;;  %v1833_v32 = vsel %vm1009_vm0, %v1801_v27, 0.0 }
 0x1a0   :  { %1834 = vadd.xlane.f32.xlu0 %v1833_v32  ;;  %v1784_v57 = vsel %vm1009_vm0, %v1742_v20, 0.0 }
 0x1a3   :  { %v3486_v38 = vpop.f32.mrb[26].mxu0  ;;  %1773 = vadd.xlane.f32.xlu1 %v1772_v35  ;;  %v2665_v39 = vpop.f32.mrb[10].mxu1  ;;  %v1744_v35 = vmul.f32 %v3357_v4, %v3357_v4 }
 0x1a4   :  { %v988_v59 = vmul.f32 %v2665_v39, %v3341_v63  ;;  %v3490_v1 = vpop.f32.mrb[27].mxu0  ;;  %1776 = vadd.xlane.f32.xlu0 %v1775_v40  ;;  %v627_v42 = vpop.f32.mrb[11].mxu1  ;;  %v1804_v54 = vmul.f32 %v2665_v39, %v2665_v39 }
 0x1a5   :  { %v987_v44 = vmul.f32 %v627_v42, %v3343_v0  ;;  %2723 = vmatprep.mubr.msk.f32.mxu0 %vm1009_vm0, %v627_v42  ;;  %2787 = vmatprep.mubr.msk.f32.mxu1 %vm1009_vm0, %v3490_v1  ;;  %v1803_v45 = vmul.f32 %v627_v42, %v627_v42 }
 0x1a6   :  { %v3497_v47 = vmul.f32 %v3486_v38, %v988_v59  ;;  %2724 = vmatmul.mubr.msk.f32.gmra.mrb[42].mxu0 %vm1009_vm0, %v2665_v39  ;;  %2788 = vmatmul.mubr.msk.f32.gmra.mrb[26].mxu1 %vm1009_vm0, %v3486_v38  ;;  %v1842_v18 = vsel %vm1009_vm0, %v1804_v54, 0.0  ;;  %v1743_v59 = vmul.f32 %v3359_v5, %v3359_v5  ;;  %v1873_v54 = vsel %vm1009_vm0, %v1857_v52, 0.0 }
 0x1a7   :  { %v3506_v0 = vmul.f32 %v987_v44, %v3490_v1  ;;  %1837 = vadd.xlane.f32.xlu1 %v1836_v48  ;;  %v1839_v50 = vsel %vm1009_vm0, %v1803_v45, 0.0  ;;  %v1858_v45 = vmul.f32 %v3365_v7, %v3365_v7  ;;  %v1862_v7 = vmul.f32 %v3409_v37, %v3409_v37 }
 0x1a8   :  { %1840 = vadd.xlane.f32.xlu0 %v1839_v50  ;;  %v1787_v44 = vsel %vm1009_vm0, %v1743_v59, 0.0 }
 0x1a9   :  { %v1876_v49 = vsel %vm1009_vm0, %v1858_v45, 0.0 }
 0x1ab   :  { %v3512_v56 = vpop.f32.mrb[28].mxu0  ;;  %1779 = vadd.xlane.f32.xlu1 %v1778_v53  ;;  %v2668_v6 = vpop.f32.mrb[12].mxu1 }
 0x1ac   :  { %v990_v63 = vmul.f32 %v2668_v6, %v3349_v2  ;;  %v3516_v11 = vpop.f32.mrb[29].mxu0  ;;  %1782 = vadd.xlane.f32.xlu0 %v1781_v8  ;;  %v637_v12 = vpop.f32.mrb[13].mxu1  ;;  %v1806_v24 = vmul.f32 %v2668_v6, %v2668_v6  ;;  %v1888_v8 = vsel %vm1009_vm0, %v1862_v7, 0.0 }
 0x1ad   :  { %v989_v13 = vmul.f32 %v637_v12, %v3351_v3  ;;  %2726 = vmatprep.mubr.msk.f32.mxu0 %vm1009_vm0, %v637_v12  ;;  %2790 = vmatprep.mubr.msk.f32.mxu1 %vm1009_vm0, %v3516_v11  ;;  %v1805_v15 = vmul.f32 %v637_v12, %v637_v12  ;;  %v1894_v12 = vsel %vm1009_vm0, %v1864_v10, 0.0  ;;  %v1976_v10 = vadd.s32 4294967248, %v3131_v62 }
 0x1ae   :  { %v3523_v16 = vmul.f32 %v3512_v56, %v990_v63  ;;  %2727 = vmatmul.mubr.msk.f32.gmra.mrb[44].mxu0 %vm1009_vm0, %v2668_v6  ;;  %2791 = vmatmul.mubr.msk.f32.gmra.mrb[28].mxu1 %vm1009_vm0, %v3512_v56  ;;  %v1848_v39 = vsel %vm1009_vm0, %v1806_v24, 0.0  ;;  %v1859_v6 = vmul.f32 %v3389_v26, %v3389_v26  ;;  %v1861_v63 = vmul.f32 %v3412_v41, %v3412_v41 }
 0x1af   :  { %v3532_v3 = vmul.f32 %v989_v13, %v3516_v11  ;;  %1843 = vadd.xlane.f32.xlu1 %v1842_v18  ;;  %v1845_v22 = vsel %vm1009_vm0, %v1805_v15, 0.0  ;;  %v1866_v26 = vmul.f32 %v3460_v19, %v3460_v19  ;;  %v1863_v13 = vmul.f32 %v3438_v55, %v3438_v55 }
 0x1b0   :  { %1846 = vadd.xlane.f32.xlu0 %v1845_v22  ;;  %v1885_v37 = vsel %vm1009_vm0, %v1861_v63, 0.0  ;;  %v1868_v41 = vmul.f32 %v3486_v38, %v3486_v38  ;;  %v1865_v18 = vmul.f32 %v3464_v23, %v3464_v23  ;;  %v1870_v55 = vmul.f32 %v3512_v56, %v3512_v56 }
 0x1b1   :  { %v1900_v15 = vsel %vm1009_vm0, %v1866_v26, 0.0  ;;  %v1891_v51 = vsel %vm1009_vm0, %v1863_v13, 0.0  ;;  %v1867_v22 = vmul.f32 %v3490_v1, %v3490_v1  ;;  %v1869_v23 = vmul.f32 %v3516_v11, %v3516_v11 }
 0x1b2   :  { %v1906_v20 = vsel %vm1009_vm0, %v1868_v41, 0.0  ;;  %v1897_v19 = vsel %vm1009_vm0, %v1865_v18, 0.0  ;;  %v1941_v56 = vadd.s32 4294967288, %v3131_v62 }
 0x1b3   :  { %v3536_v25 = vpop.f32.mrb[30].mxu0  ;;  %1785 = vadd.xlane.f32.xlu1 %v1784_v57  ;;  %v2671_v27 = vpop.f32.mrb[14].mxu1  ;;  %v1912_v57 = vsel %vm1009_vm0, %v1870_v55, 0.0  ;;  %v1903_v38 = vsel %vm1009_vm0, %v1867_v22, 0.0  ;;  %v1909_v24 = vsel %vm1009_vm0, %v1869_v23, 0.0 }
 0x1b4   :  { %v992_v29 = vmul.f32 %v2671_v27, %v3357_v4  ;;  %v647_v31 = vpop.f32.mrb[15].mxu1  ;;  %v3539_v32 = vpop.f32.mrb[31].mxu0  ;;  %v1808_v2 = vmul.f32 %v2671_v27, %v2671_v27  ;;  %v1790_v4 = vsel %vm1009_vm0, %v1744_v35, 0.0 }
 0x1b5   :  { %v991_v34 = vmul.f32 %v647_v31, %v3359_v5  ;;  %2729 = vmatprep.mubr.msk.f32.mxu0 %vm1009_vm0, %v647_v31  ;;  %2793 = vmatprep.mubr.msk.f32.mxu1 %vm1009_vm0, %v3539_v32  ;;  %v1807_v48 = vmul.f32 %v647_v31, %v647_v31  ;;  %v1860_v5 = vmul.f32 %v3384_v21, %v3384_v21  ;;  %v1879_v21 = vsel %vm1009_vm0, %v1859_v6, 0.0 }
 0x1b6   :  { %v3548_v36 = vmul.f32 %v3536_v25, %v992_v29  ;;  %2730 = vmatmul.mubr.msk.f32.gmra.mrb[46].mxu0 %vm1009_vm0, %v2671_v27  ;;  %2794 = vmatmul.mubr.msk.f32.gmra.mrb[30].mxu1 %vm1009_vm0, %v3536_v25  ;;  %v1854_v40 = vsel %vm1009_vm0, %v1808_v2, 0.0  ;;  %v3606_v27 = vshrl.u32 %v57_v61, 7 }
 0x1b7   :  { %v3558_v42 = vmul.f32 %v991_v34, %v3539_v32  ;;  %1849 = vadd.xlane.f32.xlu1 %v1848_v39  ;;  %1855 = vadd.xlane.f32.xlu0 %v1854_v40  ;;  %v1851_v50 = vsel %vm1009_vm0, %v1807_v48, 0.0  ;;  %v1882_v53 = vsel %vm1009_vm0, %v1860_v5, 0.0 }
 0x1b8   :  { %v3611_v29 = vsub.s32 %v3131_v62, %v3606_v27  ;;  %v3614_v31 = vsub.s32 %v1941_v56, %v3606_v27  ;;  %v1983_v56 = vadd.s32 4294967240, %v3131_v62 }
 0x1bb   :  { %1791 = vadd.xlane.f32.xlu1 %v1790_v4  ;;  %1788 = vadd.xlane.f32.xlu0 %v1787_v44  ;;  %v1948_v4 = vadd.s32 4294967280, %v3131_v62  ;;  %v1955_v44 = vadd.s32 4294967272, %v3131_v62 }
 0x1bd   :  { %v3626_v5 = vsub.s32 %v1948_v4, %v3606_v27  ;;  %v3629_v52 = vsub.s32 %v1955_v44, %v3606_v27 }
 0x1bf   :  { %1877 = vadd.xlane.f32.xlu1 %v1876_v49  ;;  %1852 = vadd.xlane.f32.xlu0 %v1851_v50  ;;  %v1962_v49 = vadd.s32 4294967264, %v3131_v62 }
 0x1c3   :  { %1883 = vadd.xlane.f32.xlu1 %v1882_v53  ;;  %1874 = vadd.xlane.f32.xlu0 %v1873_v54  ;;  %v3632_v53 = vsub.s32 %v1962_v49, %v3606_v27 }
 0x1c7   :  { %1889 = vadd.xlane.f32.xlu1 %v1888_v8  ;;  %1880 = vadd.xlane.f32.xlu0 %v1879_v21  ;;  %v1969_v8 = vadd.s32 4294967256, %v3131_v62 }
 0x1cb   :  { %1895 = vadd.xlane.f32.xlu1 %v1894_v12  ;;  %1886 = vadd.xlane.f32.xlu0 %v1885_v37 }
 0x1cf   :  { %1901 = vadd.xlane.f32.xlu1 %v1900_v15  ;;  %1892 = vadd.xlane.f32.xlu0 %v1891_v51  ;;  %v3643_v51 = vsub.s32 %v1969_v8, %v3606_v27 }
 0x1d3   :  { %1907 = vadd.xlane.f32.xlu1 %v1906_v20  ;;  %1898 = vadd.xlane.f32.xlu0 %v1897_v19  ;;  %v3649_v19 = vsub.s32 %v1976_v10, %v3606_v27 }
 0x1d7   :  { %1913 = vadd.xlane.f32.xlu1 %v1912_v57  ;;  %1904 = vadd.xlane.f32.xlu0 %v1903_v38 }
 0x1db   :  { %1910 = vadd.xlane.f32.xlu0 %v1909_v24 }
 0x1ec   :  { %v1750_v1 = vpop.xlane.xlu0 %1749 }
 0x1ed   :  { %v2070_v40 = vrot.slane %v1750_v1, %v3614_v31 }
 0x20c   :  { %v1814_v2 = vpop.xlane.xlu1 %1813 }
 0x20d   :  { %v2166_v11 = vrot.slane %v1814_v2, %v3614_v31  ;;  %v1811_v34 = vpop.xlane.xlu0 %1810  ;;  %v1990_v2 = vadd.s32 4294967232, %v3131_v62 }
 0x20e   :  { %v2162_v35 = vrot.slane %v1811_v34, %v3611_v29 }
 0x20f   :  { %v3666_v4 = vsub.s32 %v1990_v2, %v3606_v27 }
 0x210   :  { %v2167_v61 = vsel %vm1946_vm4, %v2166_v11, %v2162_v35  ;;  %v1747_v39 = vpop.xlane.xlu1 %1746 }
 0x211   :  { %v2066_v59 = vrot.slane %v1747_v39, %v3611_v29  ;;  %v1756_v45 = vpop.xlane.xlu0 %1755 }
 0x212   :  { %v2080_v21 = vrot.slane %v1756_v45, %v3629_v52 }
 0x213   :  { %v2071_v48 = vsel %vm1946_vm4, %v2070_v40, %v2066_v59  ;;  %v3662_v40 = vsub.s32 %v1983_v56, %v3606_v27 }
 0x214   :  { %v1820_v50 = vpop.xlane.xlu1 %1819 }
 0x215   :  { %v1759_v54 = vpop.xlane.xlu0 %1758  ;;  %v2176_v18 = vrot.slane %v1820_v50, %v3629_v52 }
 0x216   :  { %v2085_v63 = vrot.slane %v1759_v54, %v3632_v53  ;;  %v1997_v54 = vadd.s32 4294967224, %v3131_v62 }
 0x218   :  { %v1753_v7 = vpop.xlane.xlu1 %1752 }
 0x219   :  { %v2075_v6 = vrot.slane %v1753_v7, %v3626_v5 }
 0x21b   :  { %v2076_v12 = vsel %vm1953_vm5, %v2075_v6, %v2071_v48  ;;  %v2004_v6 = vadd.s32 4294967216, %v3131_v62 }
 0x21c   :  { %v2081_v37 = vsel %vm1960_vm6, %v2080_v21, %v2076_v12  ;;  %v1817_v26 = vpop.xlane.xlu1 %1816 }
 0x21d   :  { %v2171_v13 = vrot.slane %v1817_v26, %v3626_v5  ;;  %v1823_v15 = vpop.xlane.xlu0 %1822  ;;  %v2086_v41 = vsel %vm1967_vm7, %v2085_v63, %v2081_v37  ;;  %v3678_v37 = vsub.s32 %v1997_v54, %v3606_v27 }
 0x21e   :  { %v2181_v20 = vrot.slane %v1823_v15, %v3632_v53 }
 0x21f   :  { %v2172_v55 = vsel %vm1953_vm5, %v2171_v13, %v2167_v61  ;;  %v3682_v13 = vsub.s32 %v2004_v6, %v3606_v27 }
 0x220   :  { %v2177_v22 = vsel %vm1960_vm6, %v2176_v18, %v2172_v55  ;;  %v1762_v57 = vpop.xlane.xlu1 %1761 }
 0x221   :  { %v2182_v38 = vsel %vm1967_vm7, %v2181_v20, %v2177_v22  ;;  %v2090_v23 = vrot.slane %v1762_v57, %v3643_v51  ;;  %v1765_v24 = vpop.xlane.xlu0 %1764  ;;  %v2011_v22 = vadd.s32 4294967208, %v3131_v62 }
 0x222   :  { %v2095_v1 = vrot.slane %v1765_v24, %v3649_v19 }
 0x223   :  { %v2091_v11 = vsel %vm1974_vm8, %v2090_v23, %v2086_v41 }
 0x224   :  { %v2096_v34 = vsel %vm1981_vm9, %v2095_v1, %v2091_v11  ;;  %v1826_v35 = vpop.xlane.xlu1 %1825  ;;  %v3694_v11 = vsub.s32 %v2011_v22, %v3606_v27  ;;  %v2039_v22 = vadd.s32 4294967176, %v3131_v62 }
 0x225   :  { %v2186_v61 = vrot.slane %v1826_v35, %v3643_v51  ;;  %v1829_v39 = vpop.xlane.xlu0 %1828 }
 0x226   :  { %v2191_v59 = vrot.slane %v1829_v39, %v3649_v19 }
 0x227   :  { %v2187_v44 = vsel %vm1974_vm8, %v2186_v61, %v2182_v38  ;;  %v2018_v38 = vadd.s32 4294967200, %v3131_v62 }
 0x228   :  { %v2192_v45 = vsel %vm1981_vm9, %v2191_v59, %v2187_v44  ;;  %v1768_v48 = vpop.xlane.xlu1 %1767 }
 0x229   :  { %v2100_v49 = vrot.slane %v1768_v48, %v3662_v40  ;;  %v1771_v50 = vpop.xlane.xlu0 %1770  ;;  %v3698_v35 = vsub.s32 %v2018_v38, %v3606_v27  ;;  %v2025_v48 = vadd.s32 4294967192, %v3131_v62 }
 0x22a   :  { %v2105_v7 = vrot.slane %v1771_v50, %v3666_v4 }
 0x22b   :  { %v2101_v8 = vsel %vm1988_vm10, %v2100_v49, %v2096_v34 }
 0x22c   :  { %v2106_v21 = vsel %vm1995_vm11, %v2105_v7, %v2101_v8  ;;  %v1832_v10 = vpop.xlane.xlu1 %1831 }
 0x22d   :  { %v2196_v63 = vrot.slane %v1832_v10, %v3662_v40  ;;  %v1835_v12 = vpop.xlane.xlu0 %1834 }
 0x22e   :  { %v2201_v26 = vrot.slane %v1835_v12, %v3666_v4 }
 0x22f   :  { %v2197_v15 = vsel %vm1988_vm10, %v2196_v63, %v2192_v45 }
 0x230   :  { %v2202_v41 = vsel %vm1995_vm11, %v2201_v26, %v2197_v15  ;;  %v1774_v18 = vpop.xlane.xlu1 %1773 }
 0x231   :  { %v2110_v20 = vrot.slane %v1774_v18, %v3678_v37  ;;  %v1777_v55 = vpop.xlane.xlu0 %1776 }
 0x232   :  { %v2115_v57 = vrot.slane %v1777_v55, %v3682_v13 }
 0x233   :  { %v2111_v23 = vsel %vm2002_vm12, %v2110_v20, %v2106_v21  ;;  %v3709_v21 = vsub.s32 %v2025_v48, %v3606_v27 }
 0x234   :  { %v2116_v24 = vsel %vm2009_vm13, %v2115_v57, %v2111_v23  ;;  %v1838_v56 = vpop.xlane.xlu1 %1837 }
 0x235   :  { %v2206_v1 = vrot.slane %v1838_v56, %v3678_v37  ;;  %v1841_v2 = vpop.xlane.xlu0 %1840  ;;  %v3724_v56 = vsub.s32 %v2039_v22, %v3606_v27 }
 0x236   :  { %v2211_v34 = vrot.slane %v1841_v2, %v3682_v13 }
 0x237   :  { %v2207_v61 = vsel %vm2002_vm12, %v2206_v1, %v2202_v41  ;;  %v2032_v41 = vadd.s32 4294967184, %v3131_v62 }
 0x238   :  { %v2212_v39 = vsel %vm2009_vm13, %v2211_v34, %v2207_v61  ;;  %v1780_v59 = vpop.xlane.xlu1 %1779 }
 0x239   :  { %v2120_v44 = vrot.slane %v1780_v59, %v3694_v11  ;;  %v1783_v45 = vpop.xlane.xlu0 %1782  ;;  %v3718_v55 = vsub.s32 %v2032_v41, %v3606_v27  ;;  %v3739_v27 = vld [vmem:[%s3918_s9] ss:$0 sm:$0xff]  ;;  %s2895_s9 = smov [#allocation2]  }
 0x23a   :  { %v2125_v49 = vrot.slane %v1783_v45, %v3698_v35 }
 0x23b   :  { %v2121_v50 = vsel %vm2016_vm14, %v2120_v44, %v2116_v24 }
 0x23c   :  { %v2126_v54 = vsel %vm2023_vm15, %v2125_v49, %v2121_v50  ;;  %v1844_v7 = vpop.xlane.xlu1 %1843 }
 0x23d   :  { %v2216_v6 = vrot.slane %v1844_v7, %v3694_v11  ;;  %v1847_v8 = vpop.xlane.xlu0 %1846 }
 0x23e   :  { %v2221_v10 = vrot.slane %v1847_v8, %v3698_v35 }
 0x23f   :  { %v2217_v63 = vsel %vm2016_vm14, %v2216_v6, %v2212_v39 }
 0x240   :  { %v2222_v12 = vsel %vm2023_vm15, %v2221_v10, %v2217_v63  ;;  %v1786_v26 = vpop.xlane.xlu1 %1785  ;;  %v3748_v63 = vld [vmem:[%s3919_s10] ss:$0 sm:$0xff]  ;;  %s2348_s10 = sshll.u32 %s2895_s9, 4  ;;  %s2349_s10 = int_to_ptr.vmem [resolvable:$true] %s2348_s10 }
 0x241   :  { %v2130_v15 = vrot.slane %v1786_v26, %v3709_v21  ;;  %s2869_s17 = scalar_lea.vmem %s2349_s10, 64  ;;  %p2874_p1 = scmp.lt.s32.totalorder %s2349_s10, %s2349_s10 }
 0x242   :  { %p2870_p0 = scmp.ne.s32.totalorder %s2349_s10, %s2869_s17  ;;  %p2875_p2 = scmp.lt.s32.totalorder %s2869_s17, %s2869_s17 }
 0x243   :  { %v2131_v18 = vsel %vm2030_vm1, %v2130_v15, %v2126_v54 }
 0x244   :  { %v1856_v20 = vpop.xlane.xlu0 %1855  ;;  %v1850_v57 = vpop.xlane.xlu1 %1849  ;;  %p2876_p3 = por %p2875_p2, %p2874_p1 }
 0x245   :  { %v2226_v24 = vrot.slane %v1850_v57, %v3709_v21  ;;  %v2236_v62 = vrot.slane %v1856_v20, %v3724_v56 }
 0x246   :  { %p2877_p4 = pnand %p2876_p3, %p2870_p0 }
 0x247   :  { %v2227_v61 = vsel %vm2030_vm1, %v2226_v24, %v2222_v12 }
 0x248   :  { %v1789_v38 = vpop.xlane.xlu0 %1788 }
 0x249   :  { %v2135_v23 = vrot.slane %v1789_v38, %v3718_v55 }
 0x24b   :  { %v3727_v1 = vsel %vm2037_vm2, %v2135_v23, %v2131_v18 }
 0x24c   :  { %v1853_v2 = vpop.xlane.xlu0 %1852 }
 0x24d   :  { %v2231_v34 = vrot.slane %v1853_v2, %v3718_v55 }
 0x24f   :  { %v2232_v39 = vsel %vm2037_vm2, %v2231_v34, %v2227_v61 }
 0x250   :  { %v3734_v59 = vsel %vm2044_vm3, %v2236_v62, %v2232_v39 }
 0x251   :  { %v2710_v44 = vpop.f32.mrb[32].mxu0  ;;  %v2774_v45 = vpop.f32.mrb[16].mxu1 }
 0x252   :  { %v2832_v48 = vadd.f32 %v2774_v45, %v2710_v44  ;;  %v1124_v49 = vpop.f32.mrb[33].mxu0  ;;  %v1510_v50 = vpop.f32.mrb[17].mxu1 }
 0x253   :  { %v2833_v54 = vadd.f32 %v1510_v50, %v1124_v49 }
 0x254   :  { %v1612_v7 = vadd.f32 %v2832_v48, %v3739_v27 }
 0x255   :  { %v1611_v6 = vadd.f32 %v2833_v54, %v3739_v27 }
 0x256   :  { %v1628_v8 = vadd.f32 %v1612_v7, %v3373_v14 }
 0x257   :  { %v1627_v10 = vadd.f32 %v1611_v6, %v3380_v17 }
 0x258   :  { %v1644_v12 = vmax.f32 %v1628_v8, 0.0 }
 0x259   :  { %v2713_v26 = vpop.f32.mrb[34].mxu0  ;;  %v2777_v15 = vpop.f32.mrb[18].mxu1  ;;  %v1643_v41 = vmax.f32 %v1627_v10, 0.0 }
 0x25a   :  { %v2834_v18 = vadd.f32 %v2777_v15, %v2713_v26  ;;  %v1134_v20 = vpop.f32.mrb[35].mxu0  ;;  %v1520_v22 = vpop.f32.mrb[19].mxu1  ;;  %v1666_v57 = vmul.f32 %v3748_v63, %v1644_v12 }
 0x25b   :  { %v2835_v38 = vadd.f32 %v1520_v22, %v1134_v20  ;;  %v1665_v23 = vmul.f32 %v3748_v63, %v1643_v41 }
 0x25c   :  { %v1614_v14 = vadd.f32 %v2834_v18, %v3739_v27  ;;  %v1684_v17 = vsel %vm1009_vm0, %v1666_v57, 0.0 }
 0x25d   :  { %v1613_v24 = vadd.f32 %v2835_v38, %v3739_v27  ;;  %1685 = vadd.xlane.f32.xlu1 %v1684_v17  ;;  %v1681_v2 = vsel %vm1009_vm0, %v1665_v23, 0.0 }
 0x25e   :  { %v1630_v34 = vadd.f32 %v1614_v14, %v3396_v30  ;;  %1682 = vadd.xlane.f32.xlu0 %v1681_v2 }
 0x25f   :  { %v1629_v61 = vadd.f32 %v1613_v24, %v3405_v33 }
 0x260   :  { %v1646_v62 = vmax.f32 %v1630_v34, 0.0 }
 0x261   :  { %v1645_v39 = vmax.f32 %v1629_v61, 0.0  ;;  %v2716_v44 = vpop.f32.mrb[36].mxu0  ;;  %v2780_v45 = vpop.f32.mrb[20].mxu1 }
 0x262   :  { %v2836_v48 = vadd.f32 %v2780_v45, %v2716_v44  ;;  %v1144_v49 = vpop.f32.mrb[37].mxu0  ;;  %v1530_v50 = vpop.f32.mrb[21].mxu1  ;;  %v1668_v54 = vmul.f32 %v3748_v63, %v1646_v62 }
 0x263   :  { %v2837_v7 = vadd.f32 %v1530_v50, %v1144_v49  ;;  %v1667_v10 = vmul.f32 %v3748_v63, %v1645_v39 }
 0x264   :  { %v1616_v6 = vadd.f32 %v2836_v48, %v3739_v27  ;;  %v1690_v8 = vsel %vm1009_vm0, %v1668_v54, 0.0 }
 0x265   :  { %v1615_v30 = vadd.f32 %v2837_v7, %v3739_v27  ;;  %1691 = vadd.xlane.f32.xlu0 %v1690_v8  ;;  %v1687_v15 = vsel %vm1009_vm0, %v1667_v10, 0.0 }
 0x266   :  { %v1632_v33 = vadd.f32 %v1616_v6, %v3419_v43 }
 0x267   :  { %v1631_v12 = vadd.f32 %v1615_v30, %v3428_v46 }
 0x268   :  { %v1648_v26 = vmax.f32 %v1632_v33, 0.0 }
 0x269   :  { %v2719_v41 = vpop.f32.mrb[38].mxu0  ;;  %1688 = vadd.xlane.f32.xlu0 %v1687_v15  ;;  %v2783_v18 = vpop.f32.mrb[22].mxu1  ;;  %v1647_v20 = vmax.f32 %v1631_v12, 0.0 }
 0x26a   :  { %v2838_v22 = vadd.f32 %v2783_v18, %v2719_v41  ;;  %v1154_v57 = vpop.f32.mrb[39].mxu0  ;;  %v1540_v38 = vpop.f32.mrb[23].mxu1  ;;  %v1670_v23 = vmul.f32 %v3748_v63, %v1648_v26 }
 0x26b   :  { %v2839_v14 = vadd.f32 %v1540_v38, %v1154_v57  ;;  %v1669_v17 = vmul.f32 %v3748_v63, %v1647_v20 }
 0x26c   :  { %v1618_v24 = vadd.f32 %v2838_v22, %v3739_v27  ;;  %v1696_v43 = vsel %vm1009_vm0, %v1670_v23, 0.0 }
 0x26d   :  { %v1617_v46 = vadd.f32 %v2839_v14, %v3739_v27  ;;  %1697 = vadd.xlane.f32.xlu0 %v1696_v43  ;;  %v1693_v2 = vsel %vm1009_vm0, %v1669_v17, 0.0 }
 0x26e   :  { %v1634_v34 = vadd.f32 %v1618_v24, %v3445_v9  ;;  %1694 = vadd.xlane.f32.xlu1 %v1693_v2 }
 0x26f   :  { %v1633_v61 = vadd.f32 %v1617_v46, %v3454_v58 }
 0x270   :  { %v1650_v62 = vmax.f32 %v1634_v34, 0.0 }
 0x271   :  { %v1649_v39 = vmax.f32 %v1633_v61, 0.0  ;;  %v2722_v44 = vpop.f32.mrb[40].mxu0  ;;  %v2786_v45 = vpop.f32.mrb[24].mxu1 }
 0x272   :  { %v2840_v48 = vadd.f32 %v2786_v45, %v2722_v44  ;;  %v1164_v49 = vpop.f32.mrb[41].mxu0  ;;  %v1550_v50 = vpop.f32.mrb[25].mxu1  ;;  %v1672_v54 = vmul.f32 %v3748_v63, %v1650_v62 }
 0x273   :  { %v2841_v7 = vadd.f32 %v1550_v50, %v1164_v49  ;;  %v1671_v6 = vmul.f32 %v3748_v63, %v1649_v39 }
 0x274   :  { %v1620_v8 = vadd.f32 %v2840_v48, %v3739_v27  ;;  %v1702_v10 = vsel %vm1009_vm0, %v1672_v54, 0.0 }
 0x275   :  { %v1619_v9 = vadd.f32 %v2841_v7, %v3739_v27  ;;  %1703 = vadd.xlane.f32.xlu0 %v1702_v10  ;;  %v1699_v58 = vsel %vm1009_vm0, %v1671_v6, 0.0 }
 0x276   :  { %v1636_v30 = vadd.f32 %v1620_v8, %v3471_v28  ;;  %1700 = vadd.xlane.f32.xlu1 %v1699_v58 }
 0x277   :  { %v1635_v33 = vadd.f32 %v1619_v9, %v3480_v60 }
 0x278   :  { %v1652_v12 = vmax.f32 %v1636_v30, 0.0 }
 0x279   :  { %v1651_v26 = vmax.f32 %v1635_v33, 0.0  ;;  %v2725_v15 = vpop.f32.mrb[42].mxu0  ;;  %v2789_v41 = vpop.f32.mrb[26].mxu1 }
 0x27a   :  { %v2842_v18 = vadd.f32 %v2789_v41, %v2725_v15  ;;  %v1174_v20 = vpop.f32.mrb[43].mxu0  ;;  %v1560_v22 = vpop.f32.mrb[27].mxu1  ;;  %v1674_v57 = vmul.f32 %v3748_v63, %v1652_v12 }
 0x27b   :  { %v2843_v38 = vadd.f32 %v1560_v22, %v1174_v20  ;;  %v1673_v23 = vmul.f32 %v3748_v63, %v1651_v26 }
 0x27c   :  { %v1622_v14 = vadd.f32 %v2842_v18, %v3739_v27  ;;  %v1708_v17 = vsel %vm1009_vm0, %v1674_v57, 0.0 }
 0x27d   :  { %v1621_v28 = vadd.f32 %v2843_v38, %v3739_v27  ;;  %1709 = vadd.xlane.f32.xlu0 %v1708_v17  ;;  %v1705_v60 = vsel %vm1009_vm0, %v1673_v23, 0.0 }
 0x27e   :  { %v1638_v24 = vadd.f32 %v1622_v14, %v3497_v47  ;;  %1706 = vadd.xlane.f32.xlu1 %v1705_v60 }
 0x27f   :  { %v1637_v43 = vadd.f32 %v1621_v28, %v3506_v0  ;;  %v1872_v28 = vmul.f32 %v3536_v25, %v3536_v25 }
 0x280   :  { %v1654_v46 = vmax.f32 %v1638_v24, 0.0 }
 0x281   :  { %v1653_v2 = vmax.f32 %v1637_v43, 0.0  ;;  %v2728_v34 = vpop.f32.mrb[44].mxu0  ;;  %v2792_v61 = vpop.f32.mrb[28].mxu1 }
 0x282   :  { %v2844_v62 = vadd.f32 %v2792_v61, %v2728_v34  ;;  %v1184_v39 = vpop.f32.mrb[45].mxu0  ;;  %v1570_v44 = vpop.f32.mrb[29].mxu1  ;;  %v1676_v45 = vmul.f32 %v3748_v63, %v1654_v46 }
 0x283   :  { %v2845_v48 = vadd.f32 %v1570_v44, %v1184_v39  ;;  %v1675_v49 = vmul.f32 %v3748_v63, %v1653_v2  ;;  %v1875_v43 = vpop.xlane.xlu0 %1874 }
 0x284   :  { %v1624_v50 = vadd.f32 %v2844_v62, %v3739_v27  ;;  %v1714_v54 = vsel %vm1009_vm0, %v1676_v45, 0.0 }
 0x285   :  { %v1623_v47 = vadd.f32 %v2845_v48, %v3739_v27  ;;  %1715 = vadd.xlane.f32.xlu0 %v1714_v54  ;;  %v1711_v0 = vsel %vm1009_vm0, %v1675_v49, 0.0 }
 0x286   :  { %v1640_v7 = vadd.f32 %v1624_v50, %v3523_v16  ;;  %1712 = vadd.xlane.f32.xlu1 %v1711_v0 }
 0x287   :  { %v1639_v6 = vadd.f32 %v1623_v47, %v3532_v3  ;;  %v1881_v46 = vpop.xlane.xlu0 %1880 }
 0x288   :  { %v1656_v8 = vmax.f32 %v1640_v7, 0.0 }
 0x289   :  { %v1655_v10 = vmax.f32 %v1639_v6, 0.0  ;;  %v2731_v9 = vpop.f32.mrb[46].mxu0  ;;  %v2795_v58 = vpop.f32.mrb[30].mxu1 }
 0x28a   :  { %v2846_v30 = vadd.f32 %v2795_v58, %v2731_v9  ;;  %v1194_v33 = vpop.f32.mrb[47].mxu0  ;;  %v1580_v12 = vpop.f32.mrb[31].mxu1  ;;  %v1678_v26 = vmul.f32 %v3748_v63, %v1656_v8  ;;  %v2258_v58 = vrot.slane %v1875_v43, %v3611_v29 }
 0x28b   :  { %v2847_v15 = vadd.f32 %v1580_v12, %v1194_v33  ;;  %v1677_v41 = vmul.f32 %v3748_v63, %v1655_v10  ;;  %v1887_v2 = vpop.xlane.xlu0 %1886  ;;  %v2267_v33 = vrot.slane %v1881_v46, %v3626_v5 }
 0x28c   :  { %v1626_v18 = vadd.f32 %v2846_v30, %v3739_v27  ;;  %v1720_v20 = vsel %vm1009_vm0, %v1678_v26, 0.0 }
 0x28d   :  { %v1625_v16 = vadd.f32 %v2847_v15, %v3739_v27  ;;  %1721 = vadd.xlane.f32.xlu0 %v1720_v20  ;;  %v1717_v3 = vsel %vm1009_vm0, %v1677_v41, 0.0  ;;  %v1871_v27 = vmul.f32 %v3539_v32, %v3539_v32 }
 0x28e   :  { %v1642_v22 = vadd.f32 %v1626_v18, %v3548_v36  ;;  %1718 = vadd.xlane.f32.xlu1 %v1717_v3 }
 0x28f   :  { %v1641_v57 = vadd.f32 %v1625_v16, %v3558_v42  ;;  %v1918_v42 = vsel %vm1009_vm0, %v1872_v28, 0.0  ;;  %v1915_v24 = vsel %vm1009_vm0, %v1871_v27, 0.0  ;;  %v1893_v61 = vpop.xlane.xlu0 %1892 }
 0x290   :  { %v1658_v38 = vmax.f32 %v1642_v22, 0.0  ;;  %v2277_v22 = vrot.slane %v1887_v2, %v3632_v53  ;;  %v2287_v27 = vrot.slane %v1893_v61, %v3649_v19 }
 0x291   :  { %v1657_v23 = vmax.f32 %v1641_v57, 0.0 }
 0x292   :  { %v1680_v14 = vmul.f32 %v3748_v63, %v1658_v38 }
 0x293   :  { %v1679_v17 = vmul.f32 %v3748_v63, %v1657_v23  ;;  %v3816_v63 = vpop.xlane.xlu1 %1791  ;;  %v1899_v32 = vpop.xlane.xlu0 %1898 }
 0x294   :  { %v1726_v60 = vsel %vm1009_vm0, %v1680_v14, 0.0 }
 0x295   :  { %1727 = vadd.xlane.f32.xlu0 %v1726_v60  ;;  %v1723_v36 = vsel %vm1009_vm0, %v1679_v17, 0.0  ;;  %vm2335_vm0 = vcmask 1040384  }
 0x296   :  { %1724 = vadd.xlane.f32.xlu1 %v1723_v36 }
 0x297   :  { %v1878_v25 = vpop.xlane.xlu1 %1877  ;;  %v3818_v44 = vpop.xlane.xlu0 %1904 }
 0x298   :  { %v2262_v41 = vrot.slane %v1878_v25, %v3614_v31 }
 0x299   :  { %1919 = vadd.xlane.f32.xlu0 %v1918_v42 }
 0x29a   :  { %1916 = vadd.xlane.f32.xlu1 %v1915_v24  ;;  %v2263_v16 = vsel %vm1946_vm4, %v2262_v41, %v2258_v58 }
 0x29b   :  { %v1884_v34 = vpop.xlane.xlu1 %1883  ;;  %v3820_v48 = vpop.xlane.xlu0 %1910 }
 0x29c   :  { %v2272_v23 = vrot.slane %v1884_v34, %v3629_v52  ;;  %v2297_v34 = vrot.slane %v1899_v32, %v3666_v4 }
 0x29f   :  { %v1890_v62 = vpop.xlane.xlu1 %1889 }
 0x2a0   :  { %v2282_v24 = vrot.slane %v1890_v62, %v3643_v51 }
 0x2a3   :  { %v1896_v39 = vpop.xlane.xlu1 %1895 }
 0x2a7   :  { %v1902_v45 = vpop.xlane.xlu1 %1901 }
 0x2ab   :  { %v3822_v49 = vpop.xlane.xlu1 %1907 }
 0x2af   :  { %v3824_v47 = vpop.xlane.xlu1 %1913 }
 0x2ea   :  { %v1686_v0 = vpop.xlane.xlu1 %1685 }
 0x2eb   :  { %v1683_v50 = vpop.xlane.xlu0 %1682  ;;  %v1945_v6 = vrot.slane %v1686_v0, %v3614_v31 }
 0x2ec   :  { %v1940_v8 = vrot.slane %v1683_v50, %v3611_v29  ;;  %v2268_v29 = vsel %vm1953_vm5, %v2267_v33, %v2263_v16  ;;  %v2317_v33 = vrot.slane %v3820_v48, %v3698_v35 }
 0x2ed   :  { %v2273_v17 = vsel %vm1960_vm6, %v2272_v23, %v2268_v29 }
 0x2ee   :  { %v1947_v30 = vsel %vm1946_vm4, %v1945_v6, %v1940_v8  ;;  %v2278_v60 = vsel %vm1967_vm7, %v2277_v22, %v2273_v17  ;;  %v2307_v8 = vrot.slane %v3818_v44, %v3682_v13  ;;  %vm2337_vm4 = vcmask 1041408  }
 0x2ef   :  { %v2283_v46 = vsel %vm1974_vm8, %v2282_v24, %v2278_v60 }
 0x2f0   :  { %v2288_v2 = vsel %vm1981_vm9, %v2287_v27, %v2283_v46 }
 0x2f2   :  { %v1692_v54 = vpop.xlane.xlu0 %1691 }
 0x2f3   :  { %v1959_v18 = vrot.slane %v1692_v54, %v3629_v52  ;;  %v2292_v54 = vrot.slane %v1896_v39, %v3662_v40 }
 0x2f5   :  { %v2293_v0 = vsel %vm1988_vm10, %v2292_v54, %v2288_v2 }
 0x2f6   :  { %v1689_v7 = vpop.xlane.xlu0 %1688  ;;  %v2298_v6 = vsel %vm1995_vm11, %v2297_v34, %v2293_v0 }
 0x2f7   :  { %v1952_v10 = vrot.slane %v1689_v7, %v3626_v5 }
 0x2f9   :  { %v1954_v12 = vsel %vm1953_vm5, %v1952_v10, %v1947_v30  ;;  %vm2339_vm5 = vcmask 1042432  }
 0x2fa   :  { %v1698_v26 = vpop.xlane.xlu0 %1697  ;;  %v1961_v3 = vsel %vm1960_vm6, %v1959_v18, %v1954_v12  ;;  %v2140_v12 = vrot.slane %v3816_v63, %v3724_v56 }
 0x2fb   :  { %v1695_v9 = vpop.xlane.xlu1 %1694  ;;  %v1973_v31 = vrot.slane %v1698_v26, %v3643_v51 }
 0x2fc   :  { %v1966_v15 = vrot.slane %v1695_v9, %v3632_v53  ;;  %v2302_v9 = vrot.slane %v1902_v45, %v3678_v37 }
 0x2fe   :  { %v1968_v5 = vsel %vm1967_vm7, %v1966_v15, %v1961_v3  ;;  %v2303_v39 = vsel %vm2002_vm12, %v2302_v9, %v2298_v6 }
 0x2ff   :  { %v1975_v28 = vsel %vm1974_vm8, %v1973_v31, %v1968_v5  ;;  %v2308_v30 = vsel %vm2009_vm13, %v2307_v8, %v2303_v39 }
 0x302   :  { %v1704_v57 = vpop.xlane.xlu0 %1703 }
 0x303   :  { %v1701_v20 = vpop.xlane.xlu1 %1700  ;;  %v1987_v52 = vrot.slane %v1704_v57, %v3662_v40 }
 0x304   :  { %v1980_v38 = vrot.slane %v1701_v20, %v3649_v19 }
 0x306   :  { %v1982_v53 = vsel %vm1981_vm9, %v1980_v38, %v1975_v28 }
 0x307   :  { %v1989_v25 = vsel %vm1988_vm10, %v1987_v52, %v1982_v53 }
 0x30a   :  { %v1710_v36 = vpop.xlane.xlu0 %1709 }
 0x30b   :  { %v1707_v14 = vpop.xlane.xlu1 %1706  ;;  %v2001_v51 = vrot.slane %v1710_v36, %v3678_v37  ;;  %v2312_v37 = vrot.slane %v3822_v49, %v3694_v11  ;;  %v2322_v49 = vrot.slane %v3824_v47, %v3709_v21 }
 0x30c   :  { %v1994_v42 = vrot.slane %v1707_v14, %v3666_v4 }
 0x30d   :  { %v2313_v41 = vsel %vm2016_vm14, %v2312_v37, %v2308_v30 }
 0x30e   :  { %v1996_v19 = vsel %vm1995_vm11, %v1994_v42, %v1989_v25  ;;  %v2318_v48 = vsel %vm2023_vm15, %v2317_v33, %v2313_v41 }
 0x30f   :  { %v2003_v7 = vsel %vm2002_vm12, %v2001_v51, %v1996_v19  ;;  %v2323_v57 = vsel %vm2030_vm1, %v2322_v49, %v2318_v48 }
 0x312   :  { %v1716_v61 = vpop.xlane.xlu0 %1715 }
 0x313   :  { %v1713_v43 = vpop.xlane.xlu1 %1712  ;;  %v2015_v40 = vrot.slane %v1716_v61, %v3694_v11  ;;  %v2141_v11 = vsel %vm2044_vm3, %v2140_v12, %v3727_v1 }
 0x314   :  { %v2008_v50 = vrot.slane %v1713_v43, %v3682_v13 }
 0x316   :  { %v2010_v4 = vsel %vm2009_vm13, %v2008_v50, %v2003_v7 }
 0x317   :  { %v2017_v58 = vsel %vm2016_vm14, %v2015_v40, %v2010_v4 }
 0x31a   :  { %v1722_v32 = vpop.xlane.xlu0 %1721 }
 0x31b   :  { %v1719_v62 = vpop.xlane.xlu1 %1718  ;;  %v2029_v45 = vrot.slane %v1722_v32, %v3709_v21 }
 0x31c   :  { %v2022_v10 = vrot.slane %v1719_v62, %v3698_v35 }
 0x31e   :  { %v2024_v13 = vsel %vm2023_vm15, %v2022_v10, %v2017_v58 }
 0x31f   :  { %v2031_v35 = vsel %vm2030_vm1, %v2029_v45, %v2024_v13 }
 0x322   :  { %v1728_v44 = vpop.xlane.xlu0 %1727 }
 0x323   :  { %v1725_v26 = vpop.xlane.xlu1 %1724  ;;  %v2043_v18 = vrot.slane %v1728_v44, %v3724_v56 }
 0x324   :  { %v2036_v15 = vrot.slane %v1725_v26, %v3718_v55 }
 0x326   :  { %v2038_v20 = vsel %vm2037_vm2, %v2036_v15, %v2031_v35  ;;  %v1920_v63 = vpop.xlane.xlu0 %1919 }
 0x327   :  { %v2045_v16 = vsel %vm2044_vm3, %v2043_v18, %v2038_v20  ;;  %v1917_v3 = vpop.xlane.xlu1 %1916  ;;  %v2332_v5 = vrot.slane %v1920_v63, %v3724_v56 }
 0x328   :  { %v2327_v29 = vrot.slane %v1917_v3, %v3718_v55  ;;  %v2336_v22 = vsel %vm2335_vm0, %v2045_v16, %v2141_v11 }
 0x329   :  { %v2338_v38 = vsel %vm2337_vm4, %v2336_v22, %v3734_v59 }
 0x32a   :  { %v2328_v1 = vsel %vm2037_vm2, %v2327_v29, %v2323_v57 }
 0x32b   :  { %v2333_v23 = vsel %vm2044_vm3, %v2332_v5, %v2328_v1 }
 0x32c   :  { %v2340_v21 = vsel %vm2339_vm5, %v2338_v38, %v2333_v23 }
 0x32d   :  { %2341 = vst [vmem:[#allocation2] sm:$0xf] %v2340_v21 }
 0x32e   :  { %2880 = shalt.err (!%p2877_p4)
}
 0x32f   :  { %s2881_s20 = scalar_lea.hbm %s3920_s11, 64 }
 0x330   :  { %p2882_p5 = scmp.ne.s32.totalorder %s3920_s11, %s2881_s20  ;;  %p2885_p6 = scmp.lt.u32.totalorder %s2881_s20, %s3920_s11 }
 0x332   :  { %p2887_p7 = pnand %p2885_p6, %p2882_p5 }
 0x334   :  { %2890 = shalt.err (!%p2887_p7)
}
 0x335   :  { %2351 = dma.vmem_to_hbm [thread:$0]  %s2349_s10, 64, %s3920_s11, [#allocation3]  }
 0x336   :  { %2891 = dma.done.wait [#allocation3], 64  }
 0x337   :  { %2892 = vsyncadd [#allocation3], 4294967232 }
 0x338   :  { %2355 = vsyncpa [#allocation3], 1 }

</bundles_post_ra>
